<compile_context>
chip_gen: v5e
topology: v5e:2x2
jax: 0.10.0
libtpu: 0.0.40
codegen_flags: <defaults>
</compile_context>

<pallas_src>
import functools

import jax
import jax.numpy as jnp
import numpy as np
from jax import lax
from jax.experimental import pallas as pl
from jax.experimental.pallas import tpu as pltpu

LANE = 128


def _round_up(x, m):
    return (x + m - 1) // m * m


# ----------------------------- fused Pallas kernel -----------------------------

def _fused_bottleneck_kernel(*refs, stride, has_expand, identity, mxu_dtype):
    if has_expand:
        (x_ref, w1_ref, s1_ref, b1_ref, wdw_ref, sdw_ref, bdw_ref,
         w3_ref, s3_ref, b3_ref, o_ref, hpad_ref) = refs
    else:
        (x_ref, wdw_ref, sdw_ref, bdw_ref,
         w3_ref, s3_ref, b3_ref, o_ref, hpad_ref) = refs

    _, H, W, Cin_p = x_ref.shape
    _, Ho, Wo, Cout_p = o_ref.shape
    Hp, Wp, Cmid_p = hpad_ref.shape

    # ---- zero-fill the halo scratch (replaces the HBM jnp.pad pass) ----
    hpad_ref[...] = jnp.zeros_like(hpad_ref)

    x = x_ref[0]                                  # (H, W, Cin_p)

    # ---- stage 1: 1x1 expansion + BN + ReLU6, kept entirely in VMEM ----
    if has_expand:
        x2 = x.reshape(H * W, Cin_p).astype(mxu_dtype)
        h = jnp.dot(x2, w1_ref[...], preferred_element_type=jnp.float32)
        h = h * s1_ref[...] + b1_ref[...]
        h = jnp.clip(h, 0.0, 6.0)
        hpad_ref[1:H + 1, 1:W + 1, :] = h.reshape(H, W, Cmid_p)
    else:
        hpad_ref[1:H + 1, 1:W + 1, :] = x.astype(jnp.float32)

    # ---- stage 2: 3x3 depthwise (stride s) directly at output resolution ----
    wdw = wdw_ref[...]                            # (9, Cmid_p) f32
    acc = jnp.zeros((Ho, Wo, Cmid_p), jnp.float32)
    for ky in range(3):
        for kx in range(3):
            if stride == 1:
                patch = hpad_ref[ky:ky + Ho, kx:kx + Wo, :]
            else:
                patch = hpad_ref[pl.ds(ky, Ho, stride), pl.ds(kx, Wo, stride), :]
            acc = acc + patch * wdw[ky * 3 + kx].reshape(1, 1, Cmid_p)
    d = acc * sdw_ref[...].reshape(1, 1, Cmid_p) + bdw_ref[...].reshape(1, 1, Cmid_p)
    d = jnp.clip(d, 0.0, 6.0)

    # ---- stage 3: 1x1 projection + BN (+ residual, all-f32 epilogue) ----
    d2 = d.reshape(Ho * Wo, Cmid_p).astype(mxu_dtype)
    y = jnp.dot(d2, w3_ref[...], preferred_element_type=jnp.float32)
    y = y * s3_ref[...] + b3_ref[...]
    if identity:
        y = y + x.reshape(H * W, Cin_p).astype(jnp.float32)
    o_ref[...] = y.reshape(1, Ho, Wo, Cout_p).astype(o_ref.dtype)


# ----------------------------- pallas_call wrapper -----------------------------

def fused_bottleneck_nhwc(params, x_nhwc, *, stride, has_expand, identity,
                          mxu_dtype=jnp.float32):
    B, H, W, Cin_p = x_nhwc.shape
    Cmid_p = params["wdw"].shape[1]
    Cout_p = params["w3"].shape[1]
    Ho = (H - 1) // stride + 1
    Wo = (W - 1) // stride + 1

    vec_mid = pl.BlockSpec((1, Cmid_p), lambda b: (0, 0))
    vec_out = pl.BlockSpec((1, Cout_p), lambda b: (0, 0))

    in_specs = [pl.BlockSpec((1, H, W, Cin_p), lambda b: (b, 0, 0, 0))]
    operands = [x_nhwc]
    if has_expand:
        in_specs += [pl.BlockSpec((Cin_p, Cmid_p), lambda b: (0, 0)), vec_mid, vec_mid]
        operands += [params["w1"], params["s1"], params["b1"]]
    in_specs += [pl.BlockSpec((9, Cmid_p), lambda b: (0, 0)), vec_mid, vec_mid,
                 pl.BlockSpec((Cmid_p, Cout_p), lambda b: (0, 0)), vec_out, vec_out]
    operands += [params["wdw"], params["sdw"], params["bdw"],
                 params["w3"], params["s3"], params["b3"]]

    kernel = functools.partial(_fused_bottleneck_kernel, stride=stride,
                               has_expand=has_expand, identity=identity,
                               mxu_dtype=mxu_dtype)
    return pl.pallas_call(
        kernel,
        grid=(B,),
        in_specs=in_specs,
        out_specs=pl.BlockSpec((1, Ho, Wo, Cout_p), lambda b: (b, 0, 0, 0)),
        out_shape=jax.ShapeDtypeStruct((B, Ho, Wo, Cout_p), x_nhwc.dtype),
        scratch_shapes=[pltpu.VMEM((H + 2, W + 2, Cmid_p), jnp.float32)],
        compiler_params=pltpu.CompilerParams(
            dimension_semantics=("parallel",),
            vmem_limit_bytes=32 * 1024 * 1024,
        ),
    )(*operands)


def bottleneck_forward(params, x_nchw, *, stride, identity, block0, cin, cout,
                       mxu_dtype=jnp.float32):
    # NCHW (PyTorch) -> NHWC + lane-pad channels.  In a real NHWC network this
    # boundary transpose/pad happens once for the whole net, not per block.
    x = jnp.transpose(x_nchw, (0, 2, 3, 1))
    cin_p = _round_up(cin, LANE)
    if cin_p != cin:
        x = jnp.pad(x, ((0, 0), (0, 0), (0, 0), (0, cin_p - cin)))
    y = fused_bottleneck_nhwc(params, x, stride=stride, has_expand=block0,
                              identity=identity, mxu_dtype=mxu_dtype)
    y = y[..., :cout]
    return jnp.transpose(y, (0, 3, 1, 2))


# ----------------------------- BN folding & param packing -----------------------------

def _fold_bn(gamma, beta, mean, var, eps=1e-5):
    scale = gamma / jnp.sqrt(var + eps)
    bias = beta - mean * scale
    return scale.reshape(1, -1), bias.reshape(1, -1)


def pack_kernel_params(raw, *, block0=True, mxu_dtype=jnp.float32):
    outch = raw["wdw"].shape[0]
    hidden = raw["w3"].shape[0]
    cmid_p = _round_up(outch, LANE)
    cout_p = _round_up(hidden, LANE)

    def pad2(a, rows, cols):
        return jnp.pad(a, ((0, rows - a.shape[0]), (0, cols - a.shape[1])))

    p = {}
    if block0:
        inch = raw["w1"].shape[1]
        cin_p = _round_up(inch, LANE)
        w1 = raw["w1"].reshape(outch, inch).T                 # (inch, outch)
        p["w1"] = pad2(w1, cin_p, cmid_p).astype(mxu_dtype)
        s1, b1 = _fold_bn(*raw["bn1"])
        p["s1"] = pad2(s1, 1, cmid_p)
        p["b1"] = pad2(b1, 1, cmid_p)
    wdw = raw["wdw"].reshape(outch, 9).T                      # (9, outch)
    p["wdw"] = pad2(wdw, 9, cmid_p)
    sdw, bdw = _fold_bn(*raw["bndw"])
    p["sdw"] = pad2(sdw, 1, cmid_p)
    p["bdw"] = pad2(bdw, 1, cmid_p)
    w3 = raw["w3"].reshape(hidden, outch).T                   # (outch, hidden)
    p["w3"] = pad2(w3, cmid_p, cout_p).astype(mxu_dtype)
    s3, b3 = _fold_bn(*raw["bn3"])
    p["s3"] = pad2(s3, 1, cout_p)
    p["b3"] = pad2(b3, 1, cout_p)
    return p


# ----------------------------- pure-JAX reference (verification) -----------------------------

def reference_forward(raw, x_nchw, *, stride, identity, block0=True, eps=1e-5):
    def bn(y, g, b, m, v):
        g, b, m, v = (t.reshape(1, -1, 1, 1) for t in (g, b, m, v))
        return (y - m) / jnp.sqrt(v + eps) * g + b

    dn = ("NCHW", "OIHW", "NCHW")
    h = x_nchw
    if block0:
        h = lax.conv_general_dilated(h, raw["w1"], (1, 1), "VALID", dimension_numbers=dn)
        h = jnp.clip(bn(h, *raw["bn1"]), 0.0, 6.0)
    C = h.shape[1]
    h = lax.conv_general_dilated(h, raw["wdw"], (stride, stride), ((1, 1), (1, 1)),
                                 dimension_numbers=dn, feature_group_count=C)
    h = jnp.clip(bn(h, *raw["bndw"]), 0.0, 6.0)
    h = lax.conv_general_dilated(h, raw["w3"], (1, 1), "VALID", dimension_numbers=dn)
    h = bn(h, *raw["bn3"])
    return x_nchw + h if identity else h


# ----------------------------- deterministic init -----------------------------

def init_raw_params(key, inch, outch, hidden_dim):
    ks = jax.random.split(key, 6)

    def bn_params(k, c):
        k0, k1, k2, k3 = jax.random.split(k, 4)
        gamma = 1.0 + 0.1 * jax.random.normal(k0, (c,), jnp.float32)
        beta = 0.1 * jax.random.normal(k1, (c,), jnp.float32)
        mean = 0.1 * jax.random.normal(k2, (c,), jnp.float32)
        var = 0.5 + jnp.abs(jax.random.normal(k3, (c,), jnp.float32))
        return (gamma, beta, mean, var)

    return {
        "w1": 0.2 * jax.random.normal(ks[0], (outch, inch, 1, 1), jnp.float32),
        "bn1": bn_params(ks[1], outch),
        "wdw": 0.2 * jax.random.normal(ks[2], (outch, 1, 3, 3), jnp.float32),
        "bndw": bn_params(ks[3], outch),
        "w3": 0.2 * jax.random.normal(ks[4], (hidden_dim, outch, 1, 1), jnp.float32),
        "bn3": bn_params(ks[5], hidden_dim),
    }


# ----------------------------- main -----------------------------

if __name__ == "__main__":
    key = jax.random.PRNGKey(0)
    k_param, k_x = jax.random.split(key)
    B, H, W = 2, 16, 16

    configs = [
        # name,                     inch, outch, hidden, s, block0, mxu_dtype,     tol
        ("expand_s1_identity_f32",     4,     8,      4, 1, True,   jnp.float32,  1e-3),
        ("expand_s2_f32",              4,     8,      8, 2, True,   jnp.float32,  1e-3),
        ("no_expand_s1_f32",           8,     8,      4, 1, False,  jnp.float32,  1e-3),
        ("expand_s1_identity_bf16",    4,     8,      4, 1, True,   jnp.bfloat16, 1e-1),
    ]

    for name, inch, outch, hidden, s, block0, mxu_dtype, tol in configs:
        identity = (s == 1) and (inch == hidden)
        raw = init_raw_params(k_param, inch, outch, hidden)
        params = pack_kernel_params(raw, block0=block0, mxu_dtype=mxu_dtype)
        xc = inch if block0 else outch              # depthwise input channels
        x = jax.random.normal(k_x, (B, xc, H, W), jnp.float32)

        out = bottleneck_forward(params, x, stride=s, identity=identity,
                                 block0=block0, cin=xc, cout=hidden,
                                 mxu_dtype=mxu_dtype)
        out = jax.block_until_ready(out)

        ref = reference_forward(raw, x, stride=s, identity=identity, block0=block0)
        assert out.shape == ref.shape, (name, out.shape, ref.shape)
        np.testing.assert_allclose(np.asarray(out), np.asarray(ref),
                                   rtol=tol, atol=tol, err_msg=name)

    print("KERNEL_OK")
</pallas_src>

<mosaic_0001>
module attributes {stable_mosaic.version = 11 : i64} {
  func.func @_fused_bottleneck_kernel(%arg0: i32, %arg1: memref<1x16x16x128xf32, #tpu.memory_space<vmem>>, %arg2: memref<128x128xf32, #tpu.memory_space<vmem>>, %arg3: memref<1x128xf32, #tpu.memory_space<vmem>>, %arg4: memref<1x128xf32, #tpu.memory_space<vmem>>, %arg5: memref<9x128xf32, #tpu.memory_space<vmem>>, %arg6: memref<1x128xf32, #tpu.memory_space<vmem>>, %arg7: memref<1x128xf32, #tpu.memory_space<vmem>>, %arg8: memref<128x128xf32, #tpu.memory_space<vmem>>, %arg9: memref<1x128xf32, #tpu.memory_space<vmem>>, %arg10: memref<1x128xf32, #tpu.memory_space<vmem>>, %arg11: memref<1x16x16x128xf32, #tpu.memory_space<vmem>>, %arg12: memref<18x18x128xf32, #tpu.memory_space<vmem>>) attributes {dimension_semantics = [#tpu.dimension_semantics<parallel>], iteration_bounds = array<i64: 2>, scalar_prefetch = 0 : i64, scratch_operands = 1 : i64, tpu.core_type = #tpu.core_type<tc>, window_params = [{transform_indices = @transform_0, window_bounds = array<i64: 1, 16, 16, 128>}, {pipeline_mode = #tpu.pipeline_mode<synchronous>, transform_indices = @transform_1, window_bounds = array<i64: 128, 128>}, {pipeline_mode = #tpu.pipeline_mode<synchronous>, transform_indices = @transform_2, window_bounds = array<i64: 1, 128>}, {pipeline_mode = #tpu.pipeline_mode<synchronous>, transform_indices = @transform_3, window_bounds = array<i64: 1, 128>}, {pipeline_mode = #tpu.pipeline_mode<synchronous>, transform_indices = @transform_4, window_bounds = array<i64: 9, 128>}, {pipeline_mode = #tpu.pipeline_mode<synchronous>, transform_indices = @transform_5, window_bounds = array<i64: 1, 128>}, {pipeline_mode = #tpu.pipeline_mode<synchronous>, transform_indices = @transform_6, window_bounds = array<i64: 1, 128>}, {pipeline_mode = #tpu.pipeline_mode<synchronous>, transform_indices = @transform_7, window_bounds = array<i64: 128, 128>}, {pipeline_mode = #tpu.pipeline_mode<synchronous>, transform_indices = @transform_8, window_bounds = array<i64: 1, 128>}, {pipeline_mode = #tpu.pipeline_mode<synchronous>, transform_indices = @transform_9, window_bounds = array<i64: 1, 128>}, {transform_indices = @transform_10, window_bounds = array<i64: 1, 16, 16, 128>}]} {
    %cst = arith.constant 0.000000e+00 : f32
    %0 = vector.broadcast %cst : f32 to vector<18x18x128xf32>
    %c0 = arith.constant 0 : index
    %c0_0 = arith.constant 0 : index
    %c0_1 = arith.constant 0 : index
    %1 = vector.load %arg12[%c0, %c0_0, %c0_1] : memref<18x18x128xf32, #tpu.memory_space<vmem>>, vector<18x18x128xf32>
    tpu.vector_store %arg12[%c0, %c0_0, %c0_1], %0 {strides = array<i32>} : memref<18x18x128xf32, #tpu.memory_space<vmem>>, vector<18x18x128xf32>,
    %c0_2 = arith.constant 0 : index
    %c0_3 = arith.constant 0 : index
    %c0_4 = arith.constant 0 : index
    %c0_5 = arith.constant 0 : index
    %2 = vector.load %arg1[%c0_2, %c0_3, %c0_4, %c0_5] : memref<1x16x16x128xf32, #tpu.memory_space<vmem>>, vector<1x16x16x128xf32>
    %3 = vector.shape_cast %2 : vector<1x16x16x128xf32> to vector<16x16x128xf32>
    %4 = vector.shape_cast %3 : vector<16x16x128xf32> to vector<256x128xf32>
    %c0_6 = arith.constant 0 : index
    %c0_7 = arith.constant 0 : index
    %5 = vector.load %arg2[%c0_6, %c0_7] : memref<128x128xf32, #tpu.memory_space<vmem>>, vector<128x128xf32>
    %cst_8 = arith.constant dense<0.000000e+00> : vector<256x128xf32>
    %6 = tpu.matmul %4, %5, %cst_8 {dimension_numbers = #tpu.dot_dimension_numbers<[1], [0], [0], [1], [0, 0, 1, 1], [], []>} : vector<256x128xf32>, vector<128x128xf32>, vector<256x128xf32> -> vector<256x128xf32>
    %c0_9 = arith.constant 0 : index
    %c0_10 = arith.constant 0 : index
    %7 = vector.load %arg3[%c0_9, %c0_10] : memref<1x128xf32, #tpu.memory_space<vmem>>, vector<1x128xf32>
    %8 = vector.broadcast %7 : vector<1x128xf32> to vector<256x128xf32>
    %9 = arith.mulf %6, %8 : vector<256x128xf32>
    %c0_11 = arith.constant 0 : index
    %c0_12 = arith.constant 0 : index
    %10 = vector.load %arg4[%c0_11, %c0_12] : memref<1x128xf32, #tpu.memory_space<vmem>>, vector<1x128xf32>
    %11 = vector.broadcast %10 : vector<1x128xf32> to vector<256x128xf32>
    %12 = arith.addf %9, %11 : vector<256x128xf32>
    %cst_13 = arith.constant 0.000000e+00 : f32
    %cst_14 = arith.constant 6.000000e+00 : f32
    %13 = vector.broadcast %cst_13 : f32 to vector<256x128xf32>
    %14 = arith.maximumf %13, %12 : vector<256x128xf32>
    %15 = vector.broadcast %cst_14 : f32 to vector<256x128xf32>
    %16 = arith.minimumf %15, %14 : vector<256x128xf32>
    %17 = vector.shape_cast %16 : vector<256x128xf32> to vector<16x16x128xf32>
    %c1 = arith.constant 1 : index
    %c1_15 = arith.constant 1 : index
    %c0_16 = arith.constant 0 : index
    %18 = vector.load %arg12[%c1, %c1_15, %c0_16] : memref<18x18x128xf32, #tpu.memory_space<vmem>>, vector<16x16x128xf32>
    tpu.vector_store %arg12[%c1, %c1_15, %c0_16], %17 {strides = array<i32>} : memref<18x18x128xf32, #tpu.memory_space<vmem>>, vector<16x16x128xf32>,
    %c0_17 = arith.constant 0 : index
    %c0_18 = arith.constant 0 : index
    %19 = vector.load %arg5[%c0_17, %c0_18] : memref<9x128xf32, #tpu.memory_space<vmem>>, vector<9x128xf32>
    %cst_19 = arith.constant 0.000000e+00 : f32
    %20 = vector.broadcast %cst_19 : f32 to vector<16x16x128xf32>
    %c0_20 = arith.constant 0 : index
    %c0_21 = arith.constant 0 : index
    %c0_22 = arith.constant 0 : index
    %21 = vector.load %arg12[%c0_20, %c0_21, %c0_22] : memref<18x18x128xf32, #tpu.memory_space<vmem>>, vector<16x16x128xf32>
    %22 = vector.extract_strided_slice %19 {offsets = [0, 0], sizes = [1, 128], strides = [1, 1]} : vector<9x128xf32> to vector<1x128xf32>
    %23 = vector.shape_cast %22 : vector<1x128xf32> to vector<128xf32>
    %24 = vector.shape_cast %23 : vector<128xf32> to vector<1x1x128xf32>
    %25 = vector.broadcast %24 : vector<1x1x128xf32> to vector<16x16x128xf32>
    %26 = arith.mulf %21, %25 : vector<16x16x128xf32>
    %27 = arith.addf %20, %26 : vector<16x16x128xf32>
    %c0_23 = arith.constant 0 : index
    %c1_24 = arith.constant 1 : index
    %c0_25 = arith.constant 0 : index
    %28 = vector.load %arg12[%c0_23, %c1_24, %c0_25] : memref<18x18x128xf32, #tpu.memory_space<vmem>>, vector<16x16x128xf32>
    %29 = vector.extract_strided_slice %19 {offsets = [1, 0], sizes = [1, 128], strides = [1, 1]} : vector<9x128xf32> to vector<1x128xf32>
    %30 = vector.shape_cast %29 : vector<1x128xf32> to vector<128xf32>
    %31 = vector.shape_cast %30 : vector<128xf32> to vector<1x1x128xf32>
    %32 = vector.broadcast %31 : vector<1x1x128xf32> to vector<16x16x128xf32>
    %33 = arith.mulf %28, %32 : vector<16x16x128xf32>
    %34 = arith.addf %27, %33 : vector<16x16x128xf32>
    %c0_26 = arith.constant 0 : index
    %c2 = arith.constant 2 : index
    %c0_27 = arith.constant 0 : index
    %35 = vector.load %arg12[%c0_26, %c2, %c0_27] : memref<18x18x128xf32, #tpu.memory_space<vmem>>, vector<16x16x128xf32>
    %36 = vector.extract_strided_slice %19 {offsets = [2, 0], sizes = [1, 128], strides = [1, 1]} : vector<9x128xf32> to vector<1x128xf32>
    %37 = vector.shape_cast %36 : vector<1x128xf32> to vector<128xf32>
    %38 = vector.shape_cast %37 : vector<128xf32> to vector<1x1x128xf32>
    %39 = vector.broadcast %38 : vector<1x1x128xf32> to vector<16x16x128xf32>
    %40 = arith.mulf %35, %39 : vector<16x16x128xf32>
    %41 = arith.addf %34, %40 : vector<16x16x128xf32>
    %c1_28 = arith.constant 1 : index
    %c0_29 = arith.constant 0 : index
    %c0_30 = arith.constant 0 : index
    %42 = vector.load %arg12[%c1_28, %c0_29, %c0_30] : memref<18x18x128xf32, #tpu.memory_space<vmem>>, vector<16x16x128xf32>
    %43 = vector.extract_strided_slice %19 {offsets = [3, 0], sizes = [1, 128], strides = [1, 1]} : vector<9x128xf32> to vector<1x128xf32>
    %44 = vector.shape_cast %43 : vector<1x128xf32> to vector<128xf32>
    %45 = vector.shape_cast %44 : vector<128xf32> to vector<1x1x128xf32>
    %46 = vector.broadcast %45 : vector<1x1x128xf32> to vector<16x16x128xf32>
    %47 = arith.mulf %42, %46 : vector<16x16x128xf32>
    %48 = arith.addf %41, %47 : vector<16x16x128xf32>
    %c1_31 = arith.constant 1 : index
    %c1_32 = arith.constant 1 : index
    %c0_33 = arith.constant 0 : index
    %49 = vector.load %arg12[%c1_31, %c1_32, %c0_33] : memref<18x18x128xf32, #tpu.memory_space<vmem>>, vector<16x16x128xf32>
    %50 = vector.extract_strided_slice %19 {offsets = [4, 0], sizes = [1, 128], strides = [1, 1]} : vector<9x128xf32> to vector<1x128xf32>
    %51 = vector.shape_cast %50 : vector<1x128xf32> to vector<128xf32>
    %52 = vector.shape_cast %51 : vector<128xf32> to vector<1x1x128xf32>
    %53 = vector.broadcast %52 : vector<1x1x128xf32> to vector<16x16x128xf32>
    %54 = arith.mulf %49, %53 : vector<16x16x128xf32>
    %55 = arith.addf %48, %54 : vector<16x16x128xf32>
    %c1_34 = arith.constant 1 : index
    %c2_35 = arith.constant 2 : index
    %c0_36 = arith.constant 0 : index
    %56 = vector.load %arg12[%c1_34, %c2_35, %c0_36] : memref<18x18x128xf32, #tpu.memory_space<vmem>>, vector<16x16x128xf32>
    %57 = vector.extract_strided_slice %19 {offsets = [5, 0], sizes = [1, 128], strides = [1, 1]} : vector<9x128xf32> to vector<1x128xf32>
    %58 = vector.shape_cast %57 : vector<1x128xf32> to vector<128xf32>
    %59 = vector.shape_cast %58 : vector<128xf32> to vector<1x1x128xf32>
    %60 = vector.broadcast %59 : vector<1x1x128xf32> to vector<16x16x128xf32>
    %61 = arith.mulf %56, %60 : vector<16x16x128xf32>
    %62 = arith.addf %55, %61 : vector<16x16x128xf32>
    %c2_37 = arith.constant 2 : index
    %c0_38 = arith.constant 0 : index
    %c0_39 = arith.constant 0 : index
    %63 = vector.load %arg12[%c2_37, %c0_38, %c0_39] : memref<18x18x128xf32, #tpu.memory_space<vmem>>, vector<16x16x128xf32>
    %64 = vector.extract_strided_slice %19 {offsets = [6, 0], sizes = [1, 128], strides = [1, 1]} : vector<9x128xf32> to vector<1x128xf32>
    %65 = vector.shape_cast %64 : vector<1x128xf32> to vector<128xf32>
    %66 = vector.shape_cast %65 : vector<128xf32> to vector<1x1x128xf32>
    %67 = vector.broadcast %66 : vector<1x1x128xf32> to vector<16x16x128xf32>
    %68 = arith.mulf %63, %67 : vector<16x16x128xf32>
    %69 = arith.addf %62, %68 : vector<16x16x128xf32>
    %c2_40 = arith.constant 2 : index
    %c1_41 = arith.constant 1 : index
    %c0_42 = arith.constant 0 : index
    %70 = vector.load %arg12[%c2_40, %c1_41, %c0_42] : memref<18x18x128xf32, #tpu.memory_space<vmem>>, vector<16x16x128xf32>
    %71 = vector.extract_strided_slice %19 {offsets = [7, 0], sizes = [1, 128], strides = [1, 1]} : vector<9x128xf32> to vector<1x128xf32>
    %72 = vector.shape_cast %71 : vector<1x128xf32> to vector<128xf32>
    %73 = vector.shape_cast %72 : vector<128xf32> to vector<1x1x128xf32>
    %74 = vector.broadcast %73 : vector<1x1x128xf32> to vector<16x16x128xf32>
    %75 = arith.mulf %70, %74 : vector<16x16x128xf32>
    %76 = arith.addf %69, %75 : vector<16x16x128xf32>
    %c2_43 = arith.constant 2 : index
    %c2_44 = arith.constant 2 : index
    %c0_45 = arith.constant 0 : index
    %77 = vector.load %arg12[%c2_43, %c2_44, %c0_45] : memref<18x18x128xf32, #tpu.memory_space<vmem>>, vector<16x16x128xf32>
    %78 = vector.extract_strided_slice %19 {offsets = [8, 0], sizes = [1, 128], strides = [1, 1]} : vector<9x128xf32> to vector<1x128xf32>
    %79 = vector.shape_cast %78 : vector<1x128xf32> to vector<128xf32>
    %80 = vector.shape_cast %79 : vector<128xf32> to vector<1x1x128xf32>
    %81 = vector.broadcast %80 : vector<1x1x128xf32> to vector<16x16x128xf32>
    %82 = arith.mulf %77, %81 : vector<16x16x128xf32>
    %83 = arith.addf %76, %82 : vector<16x16x128xf32>
    %c0_46 = arith.constant 0 : index
    %c0_47 = arith.constant 0 : index
    %84 = vector.load %arg6[%c0_46, %c0_47] : memref<1x128xf32, #tpu.memory_space<vmem>>, vector<1x128xf32>
    %85 = vector.shape_cast %84 : vector<1x128xf32> to vector<1x1x128xf32>
    %86 = vector.broadcast %85 : vector<1x1x128xf32> to vector<16x16x128xf32>
    %87 = arith.mulf %83, %86 : vector<16x16x128xf32>
    %c0_48 = arith.constant 0 : index
    %c0_49 = arith.constant 0 : index
    %88 = vector.load %arg7[%c0_48, %c0_49] : memref<1x128xf32, #tpu.memory_space<vmem>>, vector<1x128xf32>
    %89 = vector.shape_cast %88 : vector<1x128xf32> to vector<1x1x128xf32>
    %90 = vector.broadcast %89 : vector<1x1x128xf32> to vector<16x16x128xf32>
    %91 = arith.addf %87, %90 : vector<16x16x128xf32>
    %cst_50 = arith.constant 0.000000e+00 : f32
    %cst_51 = arith.constant 6.000000e+00 : f32
    %92 = vector.broadcast %cst_50 : f32 to vector<16x16x128xf32>
    %93 = arith.maximumf %92, %91 : vector<16x16x128xf32>
    %94 = vector.broadcast %cst_51 : f32 to vector<16x16x128xf32>
    %95 = arith.minimumf %94, %93 : vector<16x16x128xf32>
    %96 = vector.shape_cast %95 : vector<16x16x128xf32> to vector<256x128xf32>
    %c0_52 = arith.constant 0 : index
    %c0_53 = arith.constant 0 : index
    %97 = vector.load %arg8[%c0_52, %c0_53] : memref<128x128xf32, #tpu.memory_space<vmem>>, vector<128x128xf32>
    %cst_54 = arith.constant dense<0.000000e+00> : vector<256x128xf32>
    %98 = tpu.matmul %96, %97, %cst_54 {dimension_numbers = #tpu.dot_dimension_numbers<[1], [0], [0], [1], [0, 0, 1, 1], [], []>} : vector<256x128xf32>, vector<128x128xf32>, vector<256x128xf32> -> vector<256x128xf32>
    %c0_55 = arith.constant 0 : index
    %c0_56 = arith.constant 0 : index
    %99 = vector.load %arg9[%c0_55, %c0_56] : memref<1x128xf32, #tpu.memory_space<vmem>>, vector<1x128xf32>
    %100 = vector.broadcast %99 : vector<1x128xf32> to vector<256x128xf32>
    %101 = arith.mulf %98, %100 : vector<256x128xf32>
    %c0_57 = arith.constant 0 : index
    %c0_58 = arith.constant 0 : index
    %102 = vector.load %arg10[%c0_57, %c0_58] : memref<1x128xf32, #tpu.memory_space<vmem>>, vector<1x128xf32>
    %103 = vector.broadcast %102 : vector<1x128xf32> to vector<256x128xf32>
    %104 = arith.addf %101, %103 : vector<256x128xf32>
    %105 = vector.shape_cast %3 : vector<16x16x128xf32> to vector<256x128xf32>
    %106 = arith.addf %104, %105 : vector<256x128xf32>
    %107 = vector.shape_cast %106 : vector<256x128xf32> to vector<1x16x16x128xf32>
    %c0_59 = arith.constant 0 : index
    %c0_60 = arith.constant 0 : index
    %c0_61 = arith.constant 0 : index
    %c0_62 = arith.constant 0 : index
    %108 = vector.load %arg11[%c0_59, %c0_60, %c0_61, %c0_62] : memref<1x16x16x128xf32, #tpu.memory_space<vmem>>, vector<1x16x16x128xf32>
    tpu.vector_store %arg11[%c0_59, %c0_60, %c0_61, %c0_62], %107 {strides = array<i32>} : memref<1x16x16x128xf32, #tpu.memory_space<vmem>>, vector<1x16x16x128xf32>,
    return
  }
  func.func @transform_0(%arg0: i32) -> (i32, i32, i32, i32) {
    %c0_i32 = arith.constant 0 : i32
    %c0_i32_0 = arith.constant 0 : i32
    %c0_i32_1 = arith.constant 0 : i32
    %c0_i32_2 = arith.constant 0 : i32
    return %arg0, %c0_i32, %c0_i32_0, %c0_i32_1 : i32, i32, i32, i32
  }
  func.func @transform_1(%arg0: i32) -> (i32, i32) {
    %c0_i32 = arith.constant 0 : i32
    %c0_i32_0 = arith.constant 0 : i32
    %c0_i32_1 = arith.constant 0 : i32
    return %c0_i32, %c0_i32_0 : i32, i32
  }
  func.func @transform_2(%arg0: i32) -> (i32, i32) {
    %c0_i32 = arith.constant 0 : i32
    %c0_i32_0 = arith.constant 0 : i32
    %c0_i32_1 = arith.constant 0 : i32
    return %c0_i32, %c0_i32_0 : i32, i32
  }
  func.func @transform_3(%arg0: i32) -> (i32, i32) {
    %c0_i32 = arith.constant 0 : i32
    %c0_i32_0 = arith.constant 0 : i32
    %c0_i32_1 = arith.constant 0 : i32
    return %c0_i32, %c0_i32_0 : i32, i32
  }
  func.func @transform_4(%arg0: i32) -> (i32, i32) {
    %c0_i32 = arith.constant 0 : i32
    %c0_i32_0 = arith.constant 0 : i32
    %c0_i32_1 = arith.constant 0 : i32
    return %c0_i32, %c0_i32_0 : i32, i32
  }
  func.func @transform_5(%arg0: i32) -> (i32, i32) {
    %c0_i32 = arith.constant 0 : i32
    %c0_i32_0 = arith.constant 0 : i32
    %c0_i32_1 = arith.constant 0 : i32
    return %c0_i32, %c0_i32_0 : i32, i32
  }
  func.func @transform_6(%arg0: i32) -> (i32, i32) {
    %c0_i32 = arith.constant 0 : i32
    %c0_i32_0 = arith.constant 0 : i32
    %c0_i32_1 = arith.constant 0 : i32
    return %c0_i32, %c0_i32_0 : i32, i32
  }
  func.func @transform_7(%arg0: i32) -> (i32, i32) {
    %c0_i32 = arith.constant 0 : i32
    %c0_i32_0 = arith.constant 0 : i32
    %c0_i32_1 = arith.constant 0 : i32
    return %c0_i32, %c0_i32_0 : i32, i32
  }
  func.func @transform_8(%arg0: i32) -> (i32, i32) {
    %c0_i32 = arith.constant 0 : i32
    %c0_i32_0 = arith.constant 0 : i32
    %c0_i32_1 = arith.constant 0 : i32
    return %c0_i32, %c0_i32_0 : i32, i32
  }
  func.func @transform_9(%arg0: i32) -> (i32, i32) {
    %c0_i32 = arith.constant 0 : i32
    %c0_i32_0 = arith.constant 0 : i32
    %c0_i32_1 = arith.constant 0 : i32
    return %c0_i32, %c0_i32_0 : i32, i32
  }
  func.func @transform_10(%arg0: i32) -> (i32, i32, i32, i32) {
    %c0_i32 = arith.constant 0 : i32
    %c0_i32_0 = arith.constant 0 : i32
    %c0_i32_1 = arith.constant 0 : i32
    %c0_i32_2 = arith.constant 0 : i32
    return %arg0, %c0_i32, %c0_i32_0, %c0_i32_1 : i32, i32, i32, i32
  }
}

</mosaic_0001>

<bundles_post_ra>
// kernel: tpu_custom_call.1
= control target key start
LH: loop header
LB: loop body
LE: loop exit
PB: predicated region body
PF: predicated region fallthrough
CT: control target
= control target key end

     0   :  { %s3875_s0 = inlined_call_operand.hbm [shape: f32[2,16,16,128], index: 0, kind: input, shape index: {}]   ;;  %s3876_s1 = inlined_call_operand.hbm [shape: f32[128,128], index: 1, kind: input, shape index: {}]   ;;  %s3877_s2 = inlined_call_operand.vmem [shape: f32[1,128], index: 2, kind: input, shape index: {}]   ;;  %s3878_s3 = inlined_call_operand.vmem [shape: f32[1,128], index: 3, kind: input, shape index: {}]   ;;  %s3879_s4 = inlined_call_operand.hbm [shape: f32[9,128], index: 4, kind: input, shape index: {}]   ;;  %s3880_s5 = inlined_call_operand.vmem [shape: f32[1,128], index: 5, kind: input, shape index: {}]   ;;  %s3881_s6 = inlined_call_operand.vmem [shape: f32[1,128], index: 6, kind: input, shape index: {}]   ;;  %s3882_s7 = inlined_call_operand.hbm [shape: f32[128,128], index: 7, kind: input, shape index: {}]   ;;  %s3883_s8 = inlined_call_operand.vmem [shape: f32[1,128], index: 8, kind: input, shape index: {}]   ;;  %s3884_s9 = inlined_call_operand.vmem [shape: f32[1,128], index: 9, kind: input, shape index: {}]   ;;  %s3885_s10 = inlined_call_operand.hbm [shape: f32[2,16,16,128], index: 10, kind: output, shape index: {}]  }
   0x1   :  { %3915 = sst [smem:[#allocation32_spill]] %s3876_s1 }
   0x2   :  { %3916 = sst [smem:[#allocation33_spill]] %s3879_s4 }
   0x3   :  { %3917 = sst [smem:[#allocation34_spill]] %s3882_s7 }
   0x4   :  { %15 = vsyncpa [#allocation4], 0 }
   0x5   :  { %17 = vsyncpa [#allocation4 + $0x1], 0 }
   0x6   :  { %18 = vsyncpa [#allocation7], 0 }
   0x7   :  { %19 = vsyncpa [#allocation10], 0 }
   0x8   :  { %20 = vsyncpa [#allocation5], 0 }
   0x9   :  { %22 = vsyncpa [#allocation5 + $0x1], 0  ;;  %s2649_s13 = smov 0   ;;  %s2651_s14 = smov 0  }
   0xa   :  { %s2653_s15 = smov 0   ;;  %s2655_s16 = smov 0  }
   0xb LB: > { %s2670_s17 = sadd.s32 4294967295, %s2584_s16   ;;  %s2209_s18 = sadd.s32 4294967294, %s2584_s16   ;;  %s2584_s16 = sphi %s2655_s16, %s3965_s16   ;;  %s2580_s15 = sphi %s2653_s15, %s3964_s15   ;;  %s2576_s14 = sphi %s2651_s14, %s3963_s14   ;;  %s2572_s13 = sphi %s2649_s13, %s3962_s13  }
   0xc   : > { %p48_p0 = scmp.ne.s32.totalorder %s2576_s14, %s2572_s13  ;;  %p49_p1 = scmp.eq.s32.totalorder %s2670_s17, 0 }
   0xd   : > { %p261_p2 = scmp.eq.s32.totalorder %s2670_s17, 1  ;;  %p267_p3 = scmp.eq.s32.totalorder %s2209_s18, 1 }
   0xe   : > { %p2679_p4 = por %p49_p1, %p48_p0  ;;  %p2210_p5 = scmp.ge.s32.totalorder %s2584_s16, 1 }
   0xf   : > { %p2684_p6 = por %p267_p3, %p48_p0  ;;  %p274_p7 = scmp.lt.s32.totalorder %s2584_s16, 3 }
  0x10   : > { %s3920_s1 = sld [smem:[#allocation32_spill]]  ;;  %s2586_s25 = smov [#allocation6]  }
  0x11   : > { %p2692_p8 = pnand %p2210_p5, %p274_p7  ;;  %s287_s26 = sshll.u32 %s2586_s25, 4  ;;  %s288_s26 = int_to_ptr.vmem [resolvable:$true] %s287_s26 }
  0x12   : > { %s3923_s4 = sld [smem:[#allocation33_spill]]  ;;  %s3886_s11 = smov 128  }
  0x13   : > { %p2279_p9 = pneg %p2692_p8  ;;  %s3887_s12 = smov 8  }
  0x14   : > { %s2589_s18 = smov [#allocation8]   ;;  %s3924_s7 = sld [smem:[#allocation34_spill]] }
  0x15   : > { %p2700_p10 = pnand %p2279_p9, %p49_p1  ;;  %s307_s21 = sshll.u32 %s2589_s18, 4  ;;  %s308_s21 = int_to_ptr.vmem [resolvable:$true] %s307_s21 }
  0x16   : > { %s285_s23 = sshll.u32 %s3920_s1, 4  ;;  %s2722_s29 = sadd.s32 1, %s2584_s16   ;;  %s286_s23 = int_to_ptr.hbm [resolvable:$true] %s285_s23 }
  0x17   : > { %2282 = dma.hbm_to_vmem [thread:$0]  (!%p2700_p10), %s286_s23, 2048, %s288_s26, [#allocation7], %s3886_s11, %s3886_s11, %s3887_s12  }
  0x18   : > { %s305_s30 = sshll.u32 %s3923_s4, 4  ;;  %s2590_s23 = smov [#allocation9]   ;;  %s306_s30 = int_to_ptr.hbm [resolvable:$true] %s305_s30 }
  0x19   : > { %2285 = dma.hbm_to_vmem [thread:$0]  (!%p2700_p10), %s306_s30, 256, %s308_s21, [#allocation7], %s3886_s11, %s3886_s11, %s3887_s12  }
  0x1a   : > { %s325_s28 = sshll.u32 %s3924_s7, 4  ;;  %s327_s26 = sshll.u32 %s2590_s23, 4  ;;  %s326_s28 = int_to_ptr.hbm [resolvable:$true] %s325_s28  ;;  %s328_s26 = int_to_ptr.vmem [resolvable:$true] %s327_s26 }
  0x1b   : > { %2288 = dma.hbm_to_vmem [thread:$0]  (!%p2700_p10), %s326_s28, 2048, %s328_s26, [#allocation10], %s3886_s11, %s3886_s11, %s3887_s12  }
  0x1c   : > { %s32_s18 = ssub.s32 %s2584_s16, %s2722_s29  ;;  %s35_s22 = sadd.s32 1, %s2580_s15 }
  0x1d   : > { %p33_p12 = scmp.eq.s32.totalorder %s32_s18, 0  ;;  %p42_p13 = scmp.ne.s32.totalorder %s2580_s15, %s2576_s14 }
  0x1e   : > { %p43_p0 = scmp.eq.s32.totalorder %s2584_s16, 0  ;;  %p2300_p5 = scmp.lt.s32.totalorder %s2584_s16, 2 }
  0x1f   : > { %s2736_s25 = scalar_select %p33_p12, %s2580_s15, %s35_s22  }
  0x20   : > { %p2740_p3 = por %p261_p2, %p42_p13  ;;  %s347_s21 = sand.u32 1, %s2580_s15  }
  0x21   : > { %3925 = sst [smem:[#allocation16_spill]] %s2736_s25  ;;  %s2229_s27 = sshll.u32 %s2584_s16, 8 }
  0x22   : > { %p44_p7 = por %p43_p0, %p42_p13  ;;  %s2215_s23 = sshll.u32 %s347_s21, 8 }
  0x23   : > { %s356_s28 = scalar_lea.hbm %s3875_s0, %s2229_s27  ;;  %s351_s18 = scalar_lea.vmem [#allocation3], %s2215_s23 }
  0x24   : > { %s357_s26 = sshll.u32 %s356_s28, 4  ;;  %s359_s11 = sshll.u32 %s351_s18, 4  ;;  %s358_s26 = int_to_ptr.hbm [resolvable:$true] %s357_s26  ;;  %s360_s11 = int_to_ptr.vmem [resolvable:$true] %s359_s11 }
  0x25   : > { %p2750_p9 = pnand %p2300_p5, %p44_p7  ;;  %s348_s12 = scalar_lea.sflag [#allocation4], %s347_s21 }
  0x26   : > { %s2480_s7 = sshra.s32 %s358_s26, 4  ;;  %s2487_s27 = scalar_lea.hbm %s3875_s0, 512  ;;  %s2481_s7 = int_to_ptr.hbm [resolvable:$true] %s2480_s7 }
  0x27   : > { %s2482_s25 = scalar_lea.hbm %s2481_s7, 256  ;;  %p2484_p10 = pneg %p2750_p9 }
  0x28   : > { %p2483_p2 = scmp.ne.s32.totalorder %s2481_s7, %s2482_s25  ;;  %p2488_p0 = scmp.lt.s32.totalorder %s2481_s7, %s3875_s0 }
  0x29   : > { %p2489_p5 = scmp.lt.s32.totalorder %s2487_s27, %s2482_s25 }
  0x2a   : > { %p2485_p12 = pnand %p2484_p10, %p2483_p2 }
  0x2b   : > { %p2490_p7 = por %p2489_p5, %p2488_p0 }
  0x2c   : > { %p2486_p13 = pneg %p2485_p12 }
  0x2e   : > { %p2491_p11 = pnand %p2490_p7, %p2486_p13 }
  0x30   : > { %2494 = shalt.err (!%p2491_p11)
}
  0x31   : > { %s3928_s21 = smov 8   ;;  %s3929_s18 = smov 128  }
  0x32   : > { %2292 = dma.hbm_to_vmem [thread:$0]  (!%p2750_p9), %s358_s26, 4096, %s360_s11, %s348_s12, %s3929_s18, %s3929_s18, %s3928_s21  }
  0x33   : > { %371 = sbr.rel (%p2692_p8) target bundleno = 644 (0x284), region = 60 }
  0x38   : > { %s2770_s1 = sand.u32 1, %s2576_s14  }
  0x39   : > { %s2219_s7 = sshll.u32 %s2770_s1, 8  ;;  %s374_s25 = scalar_lea.sflag [#allocation4], %s2770_s1 }
  0x3a   : > { %s2776_s4 = scalar_lea.vmem [#allocation3], %s2219_s7 }
  0x3b   : > { %2555 = dma.done.wait (%p2679_p4), %s374_s25, 4096  }
  0x3c   : > { %2557 = vsyncadd (%p2679_p4), %s374_s25, 4294963200 }
  0x3d   : > { %2559 = dma.done.wait (%p49_p1), [#allocation7], 2304  }
  0x3e   : > { %2561 = vsyncadd (%p49_p1), [#allocation7], 4294964992 }
  0x3f   : > { %2563 = dma.done.wait (%p49_p1), [#allocation10], 2048  }
  0x40   : > { %2565 = vsyncadd (%p49_p1), [#allocation10], 4294965248  ;;  %v531_v0 = vld [vmem:[#allocation6 + $0x78] sm:$0xff]  ;;  %v530_v1 = vld [vmem:[#allocation6 + $0x70] sm:$0xff]  ;;  %v2591_v35 = vmov 0.0   ;;  %s3580_s28 = scalar_lea.vmem [#allocation11], %s2219_s7 }
  0x41   : > { %532 = vmatpush.msra.mxu0 %v531_v0  ;;  %2231 = vmatpush.msra.mxu2 %v531_v0  ;;  %v529_v2 = vld [vmem:[#allocation6 + $0x68] sm:$0xff]  ;;  %v528_v3 = vld [vmem:[#allocation6 + $0x60] sm:$0xff]  ;;  %v527_v4 = vld [vmem:[#allocation6 + $0x58] sm:$0xff]  ;;  %433 = vst [vmem:[#allocation2 + $0x18] sm:$0xff] %v2591_v35  ;;  %s2230_s7 = sshll.u32 %s2670_s17, 8  ;;  %s2104_s19 = sshll.u32 %s3580_s28, 4  ;;  %s2105_s19 = int_to_ptr.vmem [resolvable:$true] %s2104_s19 }
  0x42   : > { %v526_v5 = vld [vmem:[#allocation6 + $0x50] sm:$0xff]  ;;  %v525_v6 = vld [vmem:[#allocation6 + $0x48] sm:$0xff]  ;;  %v524_v7 = vld [vmem:[#allocation6 + $0x40] sm:$0xff]  ;;  %434 = vst [vmem:[#allocation2 + $0x20] sm:$0xff] %v2591_v35  ;;  %s2103_s25 = scalar_lea.hbm %s3885_s10, %s2230_s7  ;;  %s2092_s17 = scalar_lea.sflag [#allocation5], %s2770_s1 }
  0x43   : > { %533 = vmatpush.msra.mxu0 %v530_v1  ;;  %2232 = vmatpush.msra.mxu2 %v530_v1  ;;  %v523_v8 = vld [vmem:[#allocation6 + $0x38] sm:$0xff]  ;;  %v522_v9 = vld [vmem:[#allocation6 + $0x30] sm:$0xff]  ;;  %v521_v10 = vld [vmem:[#allocation6 + $0x28] sm:$0xff]  ;;  %430 = vst [vmem:[#allocation2] sm:$0xff] %v2591_v35  ;;  %s2106_s24 = sshll.u32 %s2103_s25, 4  ;;  %s2530_s27 = scalar_lea.hbm %s3885_s10, 512  ;;  %s2107_s24 = int_to_ptr.hbm [resolvable:$true] %s2106_s24 }
  0x44   : > { %v520_v11 = vld [vmem:[#allocation6 + $0x20] sm:$0xff]  ;;  %v519_v12 = vld [vmem:[#allocation6 + $0x18] sm:$0xff]  ;;  %v518_v13 = vld [vmem:[#allocation6 + $0x10] sm:$0xff]  ;;  %431 = vst [vmem:[#allocation2 + $0x8] sm:$0xff] %v2591_v35  ;;  %s2524_s11 = sshra.s32 %s2107_s24, 4  ;;  %s2525_s11 = int_to_ptr.hbm [resolvable:$true] %s2524_s11 }
  0x45   : > { %534 = vmatpush.msra.mxu0 %v529_v2  ;;  %2233 = vmatpush.msra.mxu2 %v529_v2  ;;  %v517_v14 = vld [vmem:[#allocation6 + $0x8] sm:$0xff]  ;;  %v516_v15 = vld [vmem:[#allocation6] sm:$0xff]  ;;  %v486_v18 = vld [vmem:[%s2776_s4 + $0x10] sm:$0xff]  ;;  %432 = vst [vmem:[#allocation2 + $0x10] sm:$0x3] %v2591_v35  ;;  %s2526_s12 = scalar_lea.hbm %s2525_s11, 256  ;;  %p2531_p11 = scmp.lt.s32.totalorder %s2525_s11, %s3885_s10 }
  0x46   : > { %v484_v16 = vld [vmem:[%s2776_s4] sm:$0xff]  ;;  %v485_v17 = vld [vmem:[%s2776_s4 + $0x8] sm:$0xff]  ;;  %v487_v19 = vld [vmem:[%s2776_s4 + $0x18] sm:$0xff]  ;;  %435 = vst [vmem:[#allocation2 + $0x28] sm:$0x3] %v2591_v35  ;;  %p2527_p1 = scmp.ne.s32.totalorder %s2525_s11, %s2526_s12  ;;  %p2532_p9 = scmp.lt.s32.totalorder %s2530_s27, %s2526_s12 }
  0x47   : > { %535 = vmatpush.msra.mxu0 %v528_v3  ;;  %2234 = vmatpush.msra.mxu2 %v528_v3  ;;  %v488_v20 = vld [vmem:[%s2776_s4 + $0x20] sm:$0xff]  ;;  %v489_v21 = vld [vmem:[%s2776_s4 + $0x28] sm:$0xff]  ;;  %v490_v23 = vld [vmem:[%s2776_s4 + $0x30] sm:$0xff]  ;;  %436 = vst [vmem:[#allocation2 + $0x30] sm:$0xff] %v2591_v35 }
  0x48   : > { %v500_v22 = vld [vmem:[%s2776_s4 + $0x80] sm:$0xff]  ;;  %v501_v24 = vld [vmem:[%s2776_s4 + $0x88] sm:$0xff]  ;;  %v491_v25 = vld [vmem:[%s2776_s4 + $0x38] sm:$0xff]  ;;  %437 = vst [vmem:[#allocation2 + $0x38] sm:$0xff] %v2591_v35  ;;  %p2528_p4 = pnand %p2527_p1, %p2740_p3  ;;  %p2533_p2 = por %p2532_p9, %p2531_p11 }
  0x49   : > { %536 = vmatpush.msra.mxu0 %v527_v4  ;;  %2235 = vmatpush.msra.mxu2 %v527_v4  ;;  %v502_v26 = vld [vmem:[%s2776_s4 + $0x90] sm:$0xff]  ;;  %v492_v27 = vld [vmem:[%s2776_s4 + $0x40] sm:$0xff]  ;;  %v503_v28 = vld [vmem:[%s2776_s4 + $0x98] sm:$0xff]  ;;  %438 = vst [vmem:[#allocation2 + $0x40] sm:$0x3] %v2591_v35 }
  0x4a   : > { %v493_v29 = vld [vmem:[%s2776_s4 + $0x48] sm:$0xff]  ;;  %v504_v30 = vld [vmem:[%s2776_s4 + $0xa0] sm:$0xff]  ;;  %v494_v31 = vld [vmem:[%s2776_s4 + $0x50] sm:$0xff]  ;;  %439 = vst [vmem:[#allocation2 + $0x48] sm:$0xff] %v2591_v35  ;;  %p2529_p8 = pneg %p2528_p4 }
  0x4b   : > { %537 = vmatpush.msra.mxu0 %v526_v5  ;;  %2236 = vmatpush.msra.mxu2 %v526_v5  ;;  %v505_v32 = vld [vmem:[%s2776_s4 + $0xa8] sm:$0xff]  ;;  %v495_v33 = vld [vmem:[%s2776_s4 + $0x58] sm:$0xff]  ;;  %v506_v34 = vld [vmem:[%s2776_s4 + $0xb0] sm:$0xff]  ;;  %440 = vst [vmem:[#allocation2 + $0x50] sm:$0xff] %v2591_v35 }
  0x4c   : > { %v496_v36 = vld [vmem:[%s2776_s4 + $0x60] sm:$0xff]  ;;  %v507_v37 = vld [vmem:[%s2776_s4 + $0xb8] sm:$0xff]  ;;  %441 = vst [vmem:[#allocation2 + $0x58] sm:$0x3] %v2591_v35  ;;  %v497_v38 = vld [vmem:[%s2776_s4 + $0x68] sm:$0xff]  ;;  %p2534_p10 = pnand %p2533_p2, %p2529_p8 }
  0x4d   : > { %538 = vmatpush.msra.mxu0 %v525_v6  ;;  %2237 = vmatpush.msra.mxu2 %v525_v6  ;;  %442 = vst [vmem:[#allocation2 + $0x60] sm:$0xff] %v2591_v35  ;;  %v508_v39 = vld [vmem:[%s2776_s4 + $0xc0] sm:$0xff]  ;;  %v498_v40 = vld [vmem:[%s2776_s4 + $0x70] sm:$0xff]  ;;  %v509_v41 = vld [vmem:[%s2776_s4 + $0xc8] sm:$0xff] }
  0x4e   : > { %443 = vst [vmem:[#allocation2 + $0x68] sm:$0xff] %v2591_v35  ;;  %v1841_v42 = vld [vmem:[#allocation9 + $0x78] sm:$0xff]  ;;  %v499_v43 = vld [vmem:[%s2776_s4 + $0x78] sm:$0xff]  ;;  %v1840_v44 = vld [vmem:[#allocation9 + $0x70] sm:$0xff] }
  0x4f   : > { %539 = vmatpush.msra.mxu0 %v524_v7  ;;  %2238 = vmatpush.msra.mxu2 %v524_v7  ;;  %444 = vst [vmem:[#allocation2 + $0x70] sm:$0x3] %v2591_v35  ;;  %v1839_v45 = vld [vmem:[#allocation9 + $0x68] sm:$0xff]  ;;  %v510_v46 = vld [vmem:[%s2776_s4 + $0xd0] sm:$0xff]  ;;  %v1837_v50 = vld [vmem:[#allocation9 + $0x58] sm:$0xff] }
  0x50   : > { %445 = vst [vmem:[#allocation2 + $0x78] sm:$0xff] %v2591_v35  ;;  %1842 = vmatpush.msra.mxu1 %v1841_v42  ;;  %2247 = vmatpush.msra.mxu3 %v1841_v42  ;;  %v2853_v47 = vld [vmem:[%s3877_s2] ss:$0 sm:$0xff]  ;;  %v1836_v53 = vld [vmem:[#allocation9 + $0x50] sm:$0xff]  ;;  %v1835_v55 = vld [vmem:[#allocation9 + $0x48] sm:$0xff] }
  0x51   : > { %540 = vmatpush.msra.mxu0 %v523_v8  ;;  %2239 = vmatpush.msra.mxu2 %v523_v8  ;;  %446 = vst [vmem:[#allocation2 + $0x80] sm:$0xff] %v2591_v35  ;;  %v1838_v48 = vld [vmem:[#allocation9 + $0x60] sm:$0xff]  ;;  %v511_v56 = vld [vmem:[%s2776_s4 + $0xd8] sm:$0xff]  ;;  %v1833_v60 = vld [vmem:[#allocation9 + $0x38] sm:$0xff] }
  0x52   : > { %447 = vst [vmem:[#allocation2 + $0x88] sm:$0x3] %v2591_v35  ;;  %1843 = vmatpush.msra.mxu1 %v1840_v44  ;;  %2248 = vmatpush.msra.mxu3 %v1840_v44  ;;  %v2860_v49 = vld [vmem:[%s3878_s3] ss:$0 sm:$0xff]  ;;  %v1832_v63 = vld [vmem:[#allocation9 + $0x30] sm:$0xff]  ;;  %v1831_v1 = vld [vmem:[#allocation9 + $0x28] sm:$0xff] }
  0x53   : > { %541 = vmatpush.msra.mxu0 %v522_v9  ;;  %2240 = vmatpush.msra.mxu2 %v522_v9  ;;  %448 = vst [vmem:[#allocation2 + $0x90] sm:$0xff] %v2591_v35  ;;  %v1834_v58 = vld [vmem:[#allocation9 + $0x40] sm:$0xff]  ;;  %v512_v2 = vld [vmem:[%s2776_s4 + $0xe0] sm:$0xff]  ;;  %v1829_v9 = vld [vmem:[#allocation9 + $0x18] sm:$0xff] }
  0x54   : > { %449 = vst [vmem:[#allocation2 + $0x98] sm:$0xff] %v2591_v35  ;;  %1844 = vmatpush.msra.mxu1 %v1839_v45  ;;  %2249 = vmatpush.msra.mxu3 %v1839_v45  ;;  %v2884_v3 = vld [vmem:[#allocation8] sm:$0xff]  ;;  %v1830_v5 = vld [vmem:[#allocation9 + $0x20] sm:$0xff] }
  0x55   : > { %542 = vmatpush.msra.mxu0 %v521_v10  ;;  %2241 = vmatpush.msra.mxu2 %v521_v10  ;;  %450 = vst [vmem:[#allocation2 + $0xa0] sm:$0x3] %v2591_v35  ;;  %v2888_v6 = vperm.slane %v2884_v3, 0  ;;  %v913_v7 = vld [vmem:[#allocation2 + $0x1] sm:$0xff]  ;;  %v2895_v10 = vperm.slane %v2884_v3, 1 }
  0x56   : > { %451 = vst [vmem:[#allocation2 + $0xa8] sm:$0xff] %v2591_v35  ;;  %1845 = vmatpush.msra.mxu1 %v1838_v48  ;;  %2250 = vmatpush.msra.mxu3 %v1838_v48  ;;  %v514_v42 = vld [vmem:[%s2776_s4 + $0xf0] sm:$0xff]  ;;  %v2930_v48 = vperm.slane %v2884_v3, 6 }
  0x57   : > { %543 = vmatpush.msra.mxu0 %v520_v11  ;;  %2242 = vmatpush.msra.mxu2 %v520_v11  ;;  %452 = vst [vmem:[#allocation2 + $0xb0] sm:$0xff] %v2591_v35 }
  0x58   : > { %453 = vst [vmem:[#allocation2 + $0xb8] sm:$0x3] %v2591_v35  ;;  %1846 = vmatpush.msra.mxu1 %v1837_v50  ;;  %2251 = vmatpush.msra.mxu3 %v1837_v50 }
  0x59   : > { %544 = vmatpush.msra.mxu0 %v519_v12  ;;  %2243 = vmatpush.msra.mxu2 %v519_v12  ;;  %454 = vst [vmem:[#allocation2 + $0xc0] sm:$0xff] %v2591_v35 }
  0x5a   : > { %455 = vst [vmem:[#allocation2 + $0xc8] sm:$0xff] %v2591_v35  ;;  %1847 = vmatpush.msra.mxu1 %v1836_v53  ;;  %2252 = vmatpush.msra.mxu3 %v1836_v53 }
  0x5b   : > { %545 = vmatpush.msra.mxu0 %v518_v13  ;;  %2244 = vmatpush.msra.mxu2 %v518_v13  ;;  %456 = vst [vmem:[#allocation2 + $0xd0] sm:$0x3] %v2591_v35  ;;  %v1828_v13 = vld [vmem:[#allocation9 + $0x10] sm:$0xff] }
  0x5c   : > { %457 = vst [vmem:[#allocation2 + $0xd8] sm:$0xff] %v2591_v35  ;;  %1848 = vmatpush.msra.mxu1 %v1835_v55  ;;  %2253 = vmatpush.msra.mxu3 %v1835_v55 }
  0x5d   : > { %546 = vmatpush.msra.mxu0 %v517_v14  ;;  %2245 = vmatpush.msra.mxu2 %v517_v14  ;;  %458 = vst [vmem:[#allocation2 + $0xe0] sm:$0xff] %v2591_v35  ;;  %v849_v14 = vmul.f32 0.0, %v2888_v6 }
  0x5e   : > { %459 = vst [vmem:[#allocation2 + $0xe8] sm:$0x3] %v2591_v35  ;;  %1849 = vmatpush.msra.mxu1 %v1834_v58  ;;  %2254 = vmatpush.msra.mxu3 %v1834_v58 }
  0x5f   : > { %547 = vmatpush.msra.mxu0 %v516_v15  ;;  %2246 = vmatpush.msra.mxu2 %v516_v15  ;;  %460 = vst [vmem:[#allocation2 + $0xf0] sm:$0xff] %v2591_v35  ;;  %v946_v15 = vmul.f32 %v2895_v10, %v913_v7 }
  0x60   : > { %548 = vmatmul.f32.vlgmr.msra.gmra.mxu0 %v484_v16  ;;  %596 = vmatmul.f32.vlgmr.msra.gmra.mxu2 %v500_v22  ;;  %461 = vst [vmem:[#allocation2 + $0xf8] sm:$0xff] %v2591_v35  ;;  %v2903_v16 = vperm.slane %v2884_v3, 2 }
  0x61   : > { %462 = vst [vmem:[#allocation2 + $0x100] sm:$0x3] %v2591_v35  ;;  %1850 = vmatpush.msra.mxu1 %v1833_v60  ;;  %2255 = vmatpush.msra.mxu3 %v1833_v60 }
  0x62   : > { %463 = vst [vmem:[#allocation2 + $0x108] sm:$0xff] %v2591_v35 }
  0x63   : > { %464 = vst [vmem:[#allocation2 + $0x110] sm:$0xff] %v2591_v35  ;;  %1851 = vmatpush.msra.mxu1 %v1832_v63  ;;  %2256 = vmatpush.msra.mxu3 %v1832_v63  ;;  %v2947_v63 = vperm.slane %v2884_v3, 7 }
  0x64   : > { %465 = vst [vmem:[#allocation2 + $0x118] sm:$0x3] %v2591_v35 }
  0x65   : > { %466 = vst [vmem:[#allocation2 + $0x120] sm:$0xff] %v2591_v35  ;;  %1852 = vmatpush.msra.mxu1 %v1831_v1  ;;  %2257 = vmatpush.msra.mxu3 %v1831_v1 }
  0x66   : > { %467 = vst [vmem:[#allocation2 + $0x128] sm:$0xff] %v2591_v35 }
  0x67   : > { %468 = vst [vmem:[#allocation2 + $0x130] sm:$0x3] %v2591_v35  ;;  %1853 = vmatpush.msra.mxu1 %v1830_v5  ;;  %2258 = vmatpush.msra.mxu3 %v1830_v5 }
  0x68   : > { %551 = vmatmul.f32.gmra.mxu0 %v485_v17  ;;  %599 = vmatmul.f32.gmra.mxu2 %v501_v24  ;;  %469 = vst [vmem:[#allocation2 + $0x138] sm:$0xff] %v2591_v35  ;;  %v914_v17 = vld [vmem:[#allocation2 + $0x9] sm:$0xff]  ;;  %v1826_v24 = vld [vmem:[#allocation9] sm:$0xff] }
  0x69   : > { %470 = vst [vmem:[#allocation2 + $0x140] sm:$0xff] %v2591_v35  ;;  %1854 = vmatpush.msra.mxu1 %v1829_v9  ;;  %2259 = vmatpush.msra.mxu3 %v1829_v9  ;;  %v947_v22 = vmul.f32 %v2895_v10, %v914_v17  ;;  %v2951_v9 = vld [vmem:[#allocation8 + $0x8] ss:$0 sm:$0xff] }
  0x6a   : > { %471 = vst [vmem:[#allocation2 + $0x148] sm:$0x3] %v2591_v35 }
  0x6b   : > { %472 = vst [vmem:[#allocation2 + $0x150] sm:$0xff] %v2591_v35  ;;  %1855 = vmatpush.msra.mxu1 %v1828_v13  ;;  %2260 = vmatpush.msra.mxu3 %v1828_v13 }
  0x6c   : > { %473 = vst [vmem:[#allocation2 + $0x158] sm:$0xff] %v2591_v35 }
  0x6d   : > { %474 = vst [vmem:[#allocation2 + $0x160] sm:$0x3] %v2591_v35 }
  0x6e   : > { %475 = vst [vmem:[#allocation2 + $0x168] sm:$0xff] %v2591_v35 }
  0x6f   : > { %476 = vst [vmem:[#allocation2 + $0x170] sm:$0xff] %v2591_v35 }
  0x70   : > { %554 = vmatmul.f32.gmra.mxu0 %v486_v18  ;;  %602 = vmatmul.f32.gmra.mxu2 %v502_v26  ;;  %477 = vst [vmem:[#allocation2 + $0x178] sm:$0x3] %v2591_v35  ;;  %v1010_v18 = vld [vmem:[#allocation2 + $0x2] sm:$0xff] }
  0x71   : > { %478 = vst [vmem:[#allocation2 + $0x180] sm:$0xff] %v2591_v35  ;;  %v1043_v26 = vmul.f32 %v2903_v16, %v1010_v18 }
  0x72   : > { %3930 = vst [vmem:[#allocation17_spill] sm:$0xff] %v2888_v6 }
  0x73   : > { %479 = vst [vmem:[#allocation2 + $0x188] sm:$0xff] %v2591_v35 }
  0x74   : > { %480 = vst [vmem:[#allocation2 + $0x190] sm:$0x3] %v2591_v35 }
  0x75   : > { %3931 = vst [vmem:[#allocation18_spill] sm:$0xff] %v2895_v10 }
  0x76   : > { %481 = vst [vmem:[#allocation2 + $0x198] sm:$0xff] %v2591_v35 }
  0x77   : > { %482 = vst [vmem:[#allocation2 + $0x1a0] sm:$0xff] %v2591_v35 }
  0x78   : > { %557 = vmatmul.f32.gmra.mxu0 %v487_v19  ;;  %605 = vmatmul.f32.gmra.mxu2 %v503_v28  ;;  %3932 = vst [vmem:[#allocation19_spill] sm:$0xff] %v2903_v16  ;;  %v1011_v28 = vld [vmem:[#allocation2 + $0xa] sm:$0xff] }
  0x79   : > { %483 = vst [vmem:[#allocation2 + $0x1a8] sm:$0x3] %v2591_v35 }
  0x80   : > { %560 = vmatmul.f32.gmra.mxu0 %v488_v20  ;;  %608 = vmatmul.f32.gmra.mxu2 %v504_v30  ;;  %v1827_v20 = vld [vmem:[#allocation9 + $0x8] sm:$0xff] }
  0x81   : > { %1856 = vmatpush.msra.mxu1 %v1827_v20  ;;  %2261 = vmatpush.msra.mxu3 %v1827_v20 }
  0x83   : > { %1857 = vmatpush.msra.mxu1 %v1826_v24  ;;  %2262 = vmatpush.msra.mxu3 %v1826_v24 }
  0x88   : > { %563 = vmatmul.f32.gmra.mxu0 %v489_v21  ;;  %611 = vmatmul.f32.gmra.mxu2 %v505_v32  ;;  %v513_v21 = vld [vmem:[%s2776_s4 + $0xe8] sm:$0xff]  ;;  %v979_v32 = vadd.f32 %v947_v22, %v849_v14 }
  0x90   : > { %566 = vmatmul.f32.gmra.mxu0 %v490_v23  ;;  %614 = vmatmul.f32.gmra.mxu2 %v506_v34 }
  0x98   : > { %569 = vmatmul.f32.gmra.mxu0 %v491_v25  ;;  %617 = vmatmul.f32.gmra.mxu2 %v507_v37  ;;  %v978_v25 = vadd.f32 %v946_v15, %v849_v14 }
  0x9a   : > { %v1075_v35 = vadd.f32 %v1043_v26, %v978_v25  ;;  %v2972_v26 = vld [vmem:[%s3880_s5] ss:$0 sm:$0xff] }
  0xa0   : > { %572 = vmatmul.f32.gmra.mxu0 %v492_v27  ;;  %620 = vmatmul.f32.gmra.mxu2 %v508_v39  ;;  %v2912_v27 = vperm.slane %v2884_v3, 3  ;;  %v2922_v39 = vperm.slane %v2884_v3, 4 }
  0xa8   : > { %575 = vmatmul.f32.gmra.mxu0 %v493_v29  ;;  %623 = vmatmul.f32.gmra.mxu2 %v509_v41 }
  0xb0   : > { %578 = vmatmul.f32.gmra.mxu0 %v494_v31  ;;  %626 = vmatmul.f32.gmra.mxu2 %v510_v46 }
  0xb8   : > { %581 = vmatmul.f32.gmra.mxu0 %v495_v33  ;;  %629 = vmatmul.f32.gmra.mxu2 %v511_v56  ;;  %v1044_v33 = vmul.f32 %v2903_v16, %v1011_v28 }
  0xc0   : > { %584 = vmatmul.f32.gmra.mxu0 %v496_v36  ;;  %632 = vmatmul.f32.gmra.mxu2 %v512_v2  ;;  %v515_v2 = vld [vmem:[%s2776_s4 + $0xf8] sm:$0xff] }
  0xc8   : > { %587 = vmatmul.f32.gmra.mxu0 %v497_v38  ;;  %635 = vmatmul.f32.gmra.mxu2 %v513_v21 }
  0xd0   : > { %590 = vmatmul.f32.gmra.mxu0 %v498_v40  ;;  %v2925_v40 = vperm.slane %v2884_v3, 5  ;;  %638 = vmatmul.f32.gmra.mxu2 %v514_v42 }
  0xd8   : > { %593 = vmatmul.f32.gmra.mxu0 %v499_v43  ;;  %v1076_v43 = vadd.f32 %v1044_v33, %v979_v32  ;;  %641 = vmatmul.f32.gmra.mxu2 %v515_v2 }
  0xdd   : > { %v549_v51 = vpop.f32.mrf.mxu0 }
  0xde   : > { %v649_v52 = vmul.f32 %v2853_v47, %v549_v51 }
  0xe0   : > { %v685_v54 = vadd.f32 %v2860_v49, %v649_v52 }
  0xe2   : > { %v717_v57 = vmax.f32 %v685_v54, 0.0 }
  0xe4   : > { %v2873_v59 = vmin.f32 %v717_v57, 6.0 }
  0xe5   : > { %v552_v61 = vpop.f32.mrf.mxu0 }
  0xe6   : > { %782 = vst [vmem:[#allocation2 + $0x19] sm:$0xff] %v2873_v59  ;;  %v650_v62 = vmul.f32 %v2853_v47, %v552_v61  ;;  %v1237_v51 = vmul.f32 %v2922_v39, %v2873_v59 }
  0xe8   : > { %v686_v0 = vadd.f32 %v2860_v49, %v650_v62 }
  0xea   : > { %v718_v4 = vmax.f32 %v686_v0, 0.0 }
  0xec   : > { %v2892_v8 = vmin.f32 %v718_v4, 6.0 }
  0xed   : > { %v555_v11 = vpop.f32.mrf.mxu0  ;;  %v1107_v29 = vld [vmem:[#allocation2 + $0x18] sm:$0xff] }
  0xee   : > { %v651_v12 = vmul.f32 %v2853_v47, %v555_v11  ;;  %783 = vst [vmem:[#allocation2 + $0x21] sm:$0xff] %v2892_v8  ;;  %v1140_v36 = vmul.f32 %v2912_v27, %v1107_v29  ;;  %v1238_v60 = vmul.f32 %v2922_v39, %v2892_v8  ;;  %v851_v4 = vmul.f32 %v1107_v29, %v2888_v6 }
  0xf0   : > { %v687_v19 = vadd.f32 %v2860_v49, %v651_v12  ;;  %v1172_v46 = vadd.f32 %v1140_v36, %v1075_v35  ;;  %v948_v12 = vmul.f32 %v2895_v10, %v2873_v59  ;;  %v949_v59 = vmul.f32 %v2895_v10, %v2892_v8 }
  0xf2   : > { %v719_v23 = vmax.f32 %v687_v19, 0.0  ;;  %v1269_v57 = vadd.f32 %v1237_v51, %v1172_v46  ;;  %v980_v21 = vadd.f32 %v948_v12, %v851_v4  ;;  %v597_v4 = vpop.f32.mrf.mxu2 }
  0xf4   : > { %v2914_v30 = vmin.f32 %v719_v23, 6.0 }
  0xf5   : > { %v558_v31 = vpop.f32.mrf.mxu0  ;;  %v1108_v37 = vld [vmem:[#allocation2 + $0x20] sm:$0xff] }
  0xf6   : > { %784 = vst [vmem:[#allocation2 + $0x31] sm:$0xff] %v2914_v30  ;;  %v652_v34 = vmul.f32 %v2853_v47, %v558_v31  ;;  %v1301_v41 = vld [vmem:[#allocation2 + $0x1a] sm:$0xff]  ;;  %v1141_v44 = vmul.f32 %v2912_v27, %v1108_v37  ;;  %v1302_v0 = vld [vmem:[#allocation2 + $0x22] sm:$0xff]  ;;  %v852_v3 = vmul.f32 %v1108_v37, %v2888_v6  ;;  %v1529_v15 = vmul.f32 %v2947_v63, %v2914_v30 }
  0xf7   : > { %v1334_v52 = vmul.f32 %v2925_v40, %v1301_v41  ;;  %v1335_v11 = vmul.f32 %v2925_v40, %v1302_v0  ;;  %v1045_v13 = vmul.f32 %v1301_v41, %v2903_v16  ;;  %v1239_v46 = vmul.f32 %v2922_v39, %v2914_v30 }
  0xf8   : > { %v688_v38 = vadd.f32 %v2860_v49, %v652_v34  ;;  %v1173_v55 = vadd.f32 %v1141_v44, %v1076_v43  ;;  %v981_v32 = vadd.f32 %v949_v59, %v852_v3  ;;  %v2981_v34 = vld [vmem:[%s3881_s6] ss:$0 sm:$0xff]  ;;  %v950_v59 = vmul.f32 %v2895_v10, %v2914_v30 }
  0xf9   : > { %v1366_v62 = vadd.f32 %v1334_v52, %v1269_v57  ;;  %v1077_v31 = vadd.f32 %v1045_v13, %v980_v21 }
  0xfa   : > { %v720_v45 = vmax.f32 %v688_v38, 0.0  ;;  %v1270_v1 = vadd.f32 %v1238_v60, %v1173_v55  ;;  %v1046_v38 = vmul.f32 %v1302_v0, %v2903_v16 }
  0xfc   : > { %v2932_v50 = vmin.f32 %v720_v45, 6.0  ;;  %v1367_v19 = vadd.f32 %v1335_v11, %v1270_v1  ;;  %v1078_v51 = vadd.f32 %v1046_v38, %v981_v32 }
  0xfd   : > { %v561_v53 = vpop.f32.mrf.mxu0  ;;  %v2937_v54 = vld [vmem:[#allocation2 + $0x30] sm:$0xff] }
  0xfe   : > { %785 = vst [vmem:[#allocation2 + $0x39] sm:$0xff] %v2932_v50  ;;  %v653_v56 = vmul.f32 %v2853_v47, %v561_v53  ;;  %v1432_v58 = vmul.f32 %v2930_v48, %v2937_v54  ;;  %v1142_v22 = vmul.f32 %v2937_v54, %v2912_v27  ;;  %v1530_v36 = vmul.f32 %v2947_v63, %v2932_v50 }
 0x100   : > { %v689_v61 = vadd.f32 %v2860_v49, %v653_v56  ;;  %v1464_v7 = vadd.f32 %v1432_v58, %v1366_v62  ;;  %v1174_v37 = vadd.f32 %v1142_v22, %v1077_v31 }
 0x102   : > { %v721_v5 = vmax.f32 %v689_v61, 0.0  ;;  %v1561_v24 = vadd.f32 %v1529_v15, %v1464_v7  ;;  %v1271_v58 = vadd.f32 %v1239_v46, %v1174_v37  ;;  %v665_v7 = vmul.f32 %v2853_v47, %v597_v4 }
 0x104   : > { %v2958_v14 = vmin.f32 %v721_v5, 6.0  ;;  %v1240_v5 = vmul.f32 %v2922_v39, %v2932_v50 }
 0x105   : > { %v564_v17 = vpop.f32.mrf.mxu0  ;;  %v1593_v18 = vld [vmem:[#allocation2 + $0x32] sm:$0xff]  ;;  %v2975_v29 = vld [vmem:[#allocation2 + $0x3a] sm:$0xff] }
 0x106   : > { %v1400_v20 = vld [vmem:[#allocation2 + $0x38] sm:$0xff]  ;;  %786 = vst [vmem:[#allocation2 + $0x49] sm:$0xff] %v2958_v14  ;;  %v654_v23 = vmul.f32 %v2853_v47, %v564_v17  ;;  %v1626_v25 = vmul.f32 %v2951_v9, %v1593_v18  ;;  %v1627_v45 = vmul.f32 %v2951_v9, %v2975_v29  ;;  %v1336_v56 = vmul.f32 %v1593_v18, %v2925_v40 }
 0x107   : > { %v1433_v28 = vmul.f32 %v2930_v48, %v1400_v20  ;;  %v1143_v41 = vmul.f32 %v1400_v20, %v2912_v27  ;;  %v701_v17 = vadd.f32 %v2860_v49, %v665_v7 }
 0x108   : > { %v690_v8 = vadd.f32 %v2860_v49, %v654_v23  ;;  %v1658_v33 = vadd.f32 %v1626_v25, %v1561_v24  ;;  %v1368_v3 = vadd.f32 %v1336_v56, %v1271_v58  ;;  %v1337_v23 = vmul.f32 %v2975_v29, %v2925_v40 }
 0x109   : > { %v1465_v35 = vadd.f32 %v1433_v28, %v1367_v19  ;;  %v1175_v61 = vadd.f32 %v1143_v41, %v1078_v51  ;;  %v853_v19 = vmul.f32 %v2937_v54, %v2888_v6  ;;  %v733_v24 = vmax.f32 %v701_v17, 0.0 }
 0x10a   : > { %v722_v42 = vmax.f32 %v690_v8, 0.0  ;;  %v1694_v43 = vmul.f32 %v2972_v26, %v1658_v33  ;;  %v1047_v25 = vmul.f32 %v1593_v18, %v2903_v16  ;;  %v854_v28 = vmul.f32 %v1400_v20, %v2888_v6 }
 0x10b   : > { %v1562_v44 = vadd.f32 %v1530_v36, %v1465_v35  ;;  %v1272_v15 = vadd.f32 %v1240_v5, %v1175_v61  ;;  %v1531_v54 = vmul.f32 %v2947_v63, %v2958_v14  ;;  %v951_v8 = vmul.f32 %v2895_v10, %v2932_v50  ;;  %v600_v50 = vpop.f32.mrf.mxu2 }
 0x10c   : > { %v2992_v52 = vmin.f32 %v722_v42, 6.0  ;;  %v1730_v53 = vadd.f32 %v2981_v34, %v1694_v43  ;;  %v3023_v37 = vmin.f32 %v733_v24, 6.0  ;;  %v982_v38 = vadd.f32 %v950_v59, %v853_v19 }
 0x10d   : > { %v1659_v55 = vadd.f32 %v1627_v45, %v1562_v44  ;;  %v567_v57 = vpop.f32.mrf.mxu0  ;;  %v2996_v60 = vld [vmem:[#allocation2 + $0x48] sm:$0xff]  ;;  %v1369_v30 = vadd.f32 %v1337_v23, %v1272_v15  ;;  %v666_v51 = vmul.f32 %v2853_v47, %v600_v50  ;;  %v952_v19 = vmul.f32 %v2895_v10, %v2958_v14 }
 0x10e   : > { %787 = vst [vmem:[#allocation2 + $0x51] sm:$0xff] %v2992_v52  ;;  %v655_v62 = vmul.f32 %v2853_v47, %v567_v57  ;;  %v1762_v0 = vmax.f32 %v1730_v53, 0.0  ;;  %v1434_v2 = vmul.f32 %v2930_v48, %v2996_v60  ;;  %v1144_v18 = vmul.f32 %v2996_v60, %v2912_v27 }
 0x10f   : > { %v1695_v1 = vmul.f32 %v2972_v26, %v1659_v55  ;;  %v1532_v44 = vmul.f32 %v2947_v63, %v2992_v52  ;;  %798 = vst [vmem:[#allocation2 + $0xd9] sm:$0xff] %v3023_v37  ;;  %v1079_v46 = vadd.f32 %v1047_v25, %v982_v38  ;;  %v983_v53 = vadd.f32 %v951_v8, %v854_v28 }
 0x110   : > { %v691_v11 = vadd.f32 %v2860_v49, %v655_v62  ;;  %v1794_v12 = vmin.f32 %v1762_v0, 6.0  ;;  %v1466_v22 = vadd.f32 %v1434_v2, %v1368_v3  ;;  %v702_v62 = vadd.f32 %v2860_v49, %v666_v51 }
 0x111   : > { %v1731_v13 = vadd.f32 %v2981_v34, %v1695_v1  ;;  %v1176_v61 = vadd.f32 %v1144_v18, %v1079_v46  ;;  %v1048_v0 = vmul.f32 %v2975_v29, %v2903_v16  ;;  %v855_v25 = vmul.f32 %v2996_v60, %v2888_v6 }
 0x112   : > { %v723_v21 = vmax.f32 %v691_v11, 0.0  ;;  %1858 = vmatmul.f32.vlgmr.msra.gmra.mxu1 %v1794_v12  ;;  %v1563_v41 = vadd.f32 %v1531_v54, %v1466_v22  ;;  %v1241_v11 = vmul.f32 %v2922_v39, %v2958_v14  ;;  %v953_v46 = vmul.f32 %v2895_v10, %v2992_v52 }
 0x113   : > { %v1763_v32 = vmax.f32 %v1731_v13, 0.0  ;;  %v734_v13 = vmax.f32 %v702_v62, 0.0  ;;  %v1080_v3 = vadd.f32 %v1048_v0, %v983_v53 }
 0x114   : > { %v3017_v31 = vmin.f32 %v723_v21, 6.0  ;;  %v1273_v22 = vadd.f32 %v1241_v11, %v1176_v61 }
 0x115   : > { %v570_v33 = vpop.f32.mrf.mxu0  ;;  %v1595_v35 = vld [vmem:[#allocation2 + $0x4a] sm:$0xff]  ;;  %v3033_v45 = vld [vmem:[#allocation2 + $0x52] sm:$0xff]  ;;  %v1795_v56 = vmin.f32 %v1763_v32, 6.0  ;;  %v3053_v23 = vmin.f32 %v734_v13, 6.0 }
 0x116   : > { %v1402_v36 = vld [vmem:[#allocation2 + $0x50] sm:$0xff]  ;;  %788 = vst [vmem:[#allocation2 + $0x61] sm:$0xff] %v3017_v31  ;;  %v656_v20 = vmul.f32 %v2853_v47, %v570_v33  ;;  %v1628_v42 = vmul.f32 %v2951_v9, %v1595_v35  ;;  %v1629_v7 = vmul.f32 %v2951_v9, %v3033_v45  ;;  %v1338_v12 = vmul.f32 %v1595_v35, %v2925_v40  ;;  %v603_v33 = vpop.f32.mrf.mxu2 }
 0x117   : > { %v1435_v43 = vmul.f32 %v2930_v48, %v1402_v36  ;;  %v1145_v1 = vmul.f32 %v1402_v36, %v2912_v27  ;;  %799 = vst [vmem:[#allocation2 + $0xe1] sm:$0xff] %v3053_v23  ;;  %v667_v38 = vmul.f32 %v2853_v47, %v603_v33  ;;  %v856_v60 = vmul.f32 %v1402_v36, %v2888_v6 }
 0x118   : > { %v692_v55 = vadd.f32 %v2860_v49, %v656_v20  ;;  %v1660_v57 = vadd.f32 %v1628_v42, %v1563_v41  ;;  %v1370_v14 = vadd.f32 %v1338_v12, %v1273_v22  ;;  %v1049_v42 = vmul.f32 %v1595_v35, %v2903_v16 }
 0x119   : > { %v1467_v58 = vadd.f32 %v1435_v43, %v1369_v30  ;;  %v1177_v24 = vadd.f32 %v1145_v1, %v1080_v3  ;;  %v1242_v30 = vmul.f32 %v2922_v39, %v2992_v52  ;;  %v703_v50 = vadd.f32 %v2860_v49, %v667_v38 }
 0x11a   : > { %v724_v2 = vmax.f32 %v692_v55, 0.0  ;;  %1861 = vmatmul.f32.gmra.mxu1 %v1795_v56  ;;  %v1696_v4 = vmul.f32 %v2972_v26, %v1660_v57  ;;  %v1533_v36 = vmul.f32 %v2947_v63, %v3017_v31  ;;  %v1339_v55 = vmul.f32 %v3033_v45, %v2925_v40 }
 0x11b   : > { %v1564_v5 = vadd.f32 %v1532_v44, %v1467_v58  ;;  %v1274_v43 = vadd.f32 %v1242_v30, %v1177_v24  ;;  %v984_v44 = vadd.f32 %v952_v19, %v855_v25  ;;  %v735_v56 = vmax.f32 %v703_v50, 0.0 }
 0x11c   : > { %v3048_v15 = vmin.f32 %v724_v2, 6.0  ;;  %v1732_v29 = vadd.f32 %v2981_v34, %v1696_v4  ;;  %v1243_v35 = vmul.f32 %v2922_v39, %v3017_v31  ;;  %v985_v58 = vadd.f32 %v953_v46, %v856_v60 }
 0x11d   : > { %v1661_v17 = vadd.f32 %v1629_v7, %v1564_v5  ;;  %v573_v21 = vpop.f32.mrf.mxu0  ;;  %v1403_v59 = vld [vmem:[#allocation2 + $0x60] sm:$0xff]  ;;  %v1081_v52 = vadd.f32 %v1049_v42, %v984_v44  ;;  %v1050_v0 = vmul.f32 %v3033_v45, %v2903_v16  ;;  %v1371_v4 = vadd.f32 %v1339_v55, %v1274_v43 }
 0x11e   : > { %789 = vst [vmem:[#allocation2 + $0x69] sm:$0xff] %v3048_v15  ;;  %v657_v28 = vmul.f32 %v2853_v47, %v573_v21  ;;  %v1764_v32 = vmax.f32 %v1732_v29, 0.0  ;;  %v1436_v8 = vmul.f32 %v2930_v48, %v1403_v59  ;;  %v1146_v57 = vmul.f32 %v1403_v59, %v2912_v27 }
 0x11f   : > { %v1697_v54 = vmul.f32 %v2972_v26, %v1661_v17  ;;  %v1534_v7 = vmul.f32 %v2947_v63, %v3048_v15  ;;  %v3085_v11 = vmin.f32 %v735_v56, 6.0  ;;  %v954_v12 = vmul.f32 %v2895_v10, %v3017_v31  ;;  %v606_v17 = vpop.f32.mrf.mxu2 }
 0x120   : > { %v693_v18 = vadd.f32 %v2860_v49, %v657_v28  ;;  %v1796_v20 = vmin.f32 %v1764_v32, 6.0  ;;  %v1468_v53 = vadd.f32 %v1436_v8, %v1370_v14  ;;  %v1178_v21 = vadd.f32 %v1146_v57, %v1081_v52 }
 0x121   : > { %v1733_v41 = vadd.f32 %v2981_v34, %v1697_v54  ;;  %800 = vst [vmem:[#allocation2 + $0xf1] sm:$0xff] %v3085_v11  ;;  %v668_v22 = vmul.f32 %v2853_v47, %v606_v17  ;;  %v1082_v24 = vadd.f32 %v1050_v0, %v985_v58  ;;  %v1244_v14 = vmul.f32 %v2922_v39, %v3048_v15 }
 0x122   : > { %v725_v51 = vmax.f32 %v693_v18, 0.0  ;;  %1864 = vmatmul.f32.gmra.mxu1 %v1796_v20  ;;  %v1565_v3 = vadd.f32 %v1533_v36, %v1468_v53  ;;  %v857_v30 = vmul.f32 %v1403_v59, %v2888_v6  ;;  %v955_v58 = vmul.f32 %v2895_v10, %v3048_v15 }
 0x123   : > { %v1765_v62 = vmax.f32 %v1733_v41, 0.0  ;;  %v704_v33 = vadd.f32 %v2860_v49, %v668_v22  ;;  %v1275_v41 = vadd.f32 %v1243_v35, %v1178_v21 }
 0x124   : > { %v3079_v61 = vmin.f32 %v725_v51, 6.0  ;;  %v986_v57 = vadd.f32 %v954_v12, %v857_v30 }
 0x125   : > { %v576_v1 = vpop.f32.mrf.mxu0  ;;  %v1597_v2 = vld [vmem:[#allocation2 + $0x62] sm:$0xff]  ;;  %v1598_v19 = vld [vmem:[#allocation2 + $0x6a] sm:$0xff]  ;;  %v1797_v28 = vmin.f32 %v1765_v62, 6.0  ;;  %v736_v42 = vmax.f32 %v704_v33, 0.0 }
 0x126   : > { %v1404_v5 = vld [vmem:[#allocation2 + $0x68] sm:$0xff]  ;;  %790 = vst [vmem:[#allocation2 + $0x79] sm:$0xff] %v3079_v61  ;;  %v658_v13 = vmul.f32 %v2853_v47, %v576_v1  ;;  %v1630_v29 = vmul.f32 %v2951_v9, %v1597_v2  ;;  %v1340_v8 = vmul.f32 %v1597_v2, %v2925_v40  ;;  %v1631_v20 = vmul.f32 %v2951_v9, %v1598_v19 }
 0x127   : > { %v1437_v45 = vmul.f32 %v2930_v48, %v1404_v5  ;;  %v1147_v25 = vmul.f32 %v1404_v5, %v2912_v27  ;;  %v1051_v50 = vmul.f32 %v1597_v2, %v2903_v16  ;;  %v858_v53 = vmul.f32 %v1404_v5, %v2888_v6  ;;  %v609_v1 = vpop.f32.mrf.mxu2 }
 0x128   : > { %v694_v31 = vadd.f32 %v2860_v49, %v658_v13  ;;  %v1662_v32 = vadd.f32 %v1630_v29, %v1565_v3  ;;  %v1372_v59 = vadd.f32 %v1340_v8, %v1275_v41  ;;  %v3107_v56 = vmin.f32 %v736_v42, 6.0 }
 0x129   : > { %v1469_v54 = vadd.f32 %v1437_v45, %v1371_v4  ;;  %v1179_v43 = vadd.f32 %v1147_v25, %v1082_v24  ;;  %v669_v4 = vmul.f32 %v2853_v47, %v609_v1  ;;  %v1083_v5 = vadd.f32 %v1051_v50, %v986_v57 }
 0x12a   : > { %v726_v38 = vmax.f32 %v694_v31, 0.0  ;;  %1867 = vmatmul.f32.gmra.mxu1 %v1797_v28  ;;  %v1698_v60 = vmul.f32 %v2972_v26, %v1662_v32  ;;  %3933 = vst [vmem:[#allocation20_spill] sm:$0xff] %v3107_v56  ;;  %v987_v3 = vadd.f32 %v955_v58, %v858_v53  ;;  %v1535_v45 = vmul.f32 %v2947_v63, %v3079_v61 }
 0x12b   : > { %v1566_v18 = vadd.f32 %v1534_v7, %v1469_v54  ;;  %801 = vst [vmem:[#allocation2 + $0xf9] sm:$0xff] %v3107_v56  ;;  %v1276_v2 = vadd.f32 %v1244_v14, %v1179_v43  ;;  %v1341_v17 = vmul.f32 %v1598_v19, %v2925_v40  ;;  %v705_v21 = vadd.f32 %v2860_v49, %v669_v4 }
 0x12c   : > { %v758_v44 = vmin.f32 %v726_v38, 6.0  ;;  %v1734_v46 = vadd.f32 %v2981_v34, %v1698_v60  ;;  %v1245_v25 = vmul.f32 %v2922_v39, %v3079_v61  ;;  %v1052_v31 = vmul.f32 %v1598_v19, %v2903_v16 }
 0x12d   : > { %v1663_v51 = vadd.f32 %v1631_v20, %v1566_v18  ;;  %v579_v36 = vpop.f32.mrf.mxu0  ;;  %v1405_v55 = vld [vmem:[#allocation2 + $0x78] sm:$0xff]  ;;  %v1373_v32 = vadd.f32 %v1341_v17, %v1276_v2  ;;  %v737_v54 = vmax.f32 %v705_v21, 0.0  ;;  %v956_v38 = vmul.f32 %v2895_v10, %v3079_v61 }
 0x12e   : > { %791 = vst [vmem:[#allocation2 + $0x81] sm:$0xff] %v758_v44  ;;  %v659_v35 = vmul.f32 %v2853_v47, %v579_v36  ;;  %v1766_v62 = vmax.f32 %v1734_v46, 0.0  ;;  %v1438_v0 = vmul.f32 %v2930_v48, %v1405_v55  ;;  %v1148_v7 = vmul.f32 %v1405_v55, %v2912_v27 }
 0x12f   : > { %v1699_v52 = vmul.f32 %v2972_v26, %v1663_v51  ;;  %v859_v8 = vmul.f32 %v1405_v55, %v2888_v6  ;;  %v1536_v14 = vmul.f32 %v2947_v63, %v758_v44  ;;  %v1084_v30 = vadd.f32 %v1052_v31, %v987_v3  ;;  %v612_v36 = vpop.f32.mrf.mxu2 }
 0x130   : > { %v695_v12 = vadd.f32 %v2860_v49, %v659_v35  ;;  %v1798_v15 = vmin.f32 %v1766_v62, 6.0  ;;  %v1470_v29 = vadd.f32 %v1438_v0, %v1372_v59  ;;  %v1180_v24 = vadd.f32 %v1148_v7, %v1083_v5 }
 0x131   : > { %v1735_v13 = vadd.f32 %v2981_v34, %v1699_v52  ;;  %v3132_v42 = vmin.f32 %v737_v54, 6.0  ;;  %v1246_v19 = vmul.f32 %v2922_v39, %v758_v44  ;;  %v957_v43 = vmul.f32 %v2895_v10, %v758_v44 }
 0x132   : > { %v727_v22 = vmax.f32 %v695_v12, 0.0  ;;  %1870 = vmatmul.f32.gmra.mxu1 %v1798_v15  ;;  %v1567_v18 = vadd.f32 %v1535_v45, %v1470_v29  ;;  %v1277_v61 = vadd.f32 %v1245_v25, %v1180_v24  ;;  %v670_v55 = vmul.f32 %v2853_v47, %v612_v36 }
 0x133   : > { %v1767_v28 = vmax.f32 %v1735_v13, 0.0  ;;  %3934 = vst [vmem:[#allocation21_spill] sm:$0xff] %v3132_v42  ;;  %v988_v58 = vadd.f32 %v956_v38, %v859_v8 }
 0x134   : > { %v3127_v33 = vmin.f32 %v727_v22, 6.0  ;;  %802 = vst [vmem:[#allocation2 + $0x109] sm:$0xff] %v3132_v42  ;;  %v706_v1 = vadd.f32 %v2860_v49, %v670_v55 }
 0x135   : > { %v582_v60 = vpop.f32.mrf.mxu0  ;;  %v1599_v20 = vld [vmem:[#allocation2 + $0x7a] sm:$0xff]  ;;  %v1600_v53 = vld [vmem:[#allocation2 + $0x82] sm:$0xff]  ;;  %v1799_v59 = vmin.f32 %v1767_v28, 6.0 }
 0x136   : > { %v1406_v41 = vld [vmem:[#allocation2 + $0x80] sm:$0xff]  ;;  %792 = vst [vmem:[#allocation2 + $0x91] sm:$0xff] %v3127_v33  ;;  %v660_v50 = vmul.f32 %v2853_v47, %v582_v60  ;;  %v1632_v46 = vmul.f32 %v2951_v9, %v1599_v20  ;;  %v1342_v52 = vmul.f32 %v1599_v20, %v2925_v40  ;;  %v1633_v0 = vmul.f32 %v2951_v9, %v1600_v53 }
 0x137   : > { %v1439_v51 = vmul.f32 %v2930_v48, %v1406_v41  ;;  %v1149_v57 = vmul.f32 %v1406_v41, %v2912_v27  ;;  %v1053_v4 = vmul.f32 %v1599_v20, %v2903_v16  ;;  %v1537_v15 = vmul.f32 %v2947_v63, %v3127_v33 }
 0x138   : > { %v696_v44 = vadd.f32 %v2860_v49, %v660_v50  ;;  %v1664_v35 = vadd.f32 %v1632_v46, %v1567_v18  ;;  %v738_v13 = vmax.f32 %v706_v1, 0.0  ;;  %v1343_v29 = vmul.f32 %v1600_v53, %v2925_v40  ;;  %v615_v18 = vpop.f32.mrf.mxu2 }
 0x139   : > { %v1471_v62 = vadd.f32 %v1439_v51, %v1373_v32  ;;  %v1181_v2 = vadd.f32 %v1149_v57, %v1084_v30  ;;  %v860_v45 = vmul.f32 %v1406_v41, %v2888_v6  ;;  %v1374_v24 = vadd.f32 %v1342_v52, %v1277_v61 }
 0x13a   : > { %v728_v5 = vmax.f32 %v696_v44, 0.0  ;;  %1873 = vmatmul.f32.gmra.mxu1 %v1799_v59  ;;  %v1700_v7 = vmul.f32 %v2972_v26, %v1664_v35  ;;  %v3154_v28 = vmin.f32 %v738_v13, 6.0  ;;  %v1085_v32 = vadd.f32 %v1053_v4, %v988_v58  ;;  %v3176_v4 = vld [vmem:[#allocation2 + $0xd8] sm:$0xff] }
 0x13b   : > { %v1568_v12 = vadd.f32 %v1536_v14, %v1471_v62  ;;  %v1278_v3 = vadd.f32 %v1246_v19, %v1181_v2  ;;  %v1247_v54 = vmul.f32 %v2922_v39, %v3127_v33  ;;  %v989_v8 = vadd.f32 %v957_v43, %v860_v45  ;;  %v3172_v62 = vld [vmem:[#allocation2 + $0xda] sm:$0xff] }
 0x13c   : > { %v760_v17 = vmin.f32 %v728_v5, 6.0  ;;  %v1736_v21 = vadd.f32 %v2981_v34, %v1700_v7  ;;  %3935 = vst [vmem:[#allocation22_spill] sm:$0xff] %v3154_v28  ;;  %v671_v41 = vmul.f32 %v2853_v47, %v615_v18  ;;  %v1054_v50 = vmul.f32 %v1600_v53, %v2903_v16 }
 0x13d   : > { %v1665_v22 = vadd.f32 %v1633_v0, %v1568_v12  ;;  %v585_v25 = vpop.f32.mrf.mxu0  ;;  %v1407_v31 = vld [vmem:[#allocation2 + $0x90] sm:$0xff]  ;;  %803 = vst [vmem:[#allocation2 + $0x111] sm:$0xff] %v3154_v28  ;;  %v1375_v20 = vadd.f32 %v1343_v29, %v1278_v3  ;;  %v958_v57 = vmul.f32 %v2895_v10, %v3127_v33  ;;  %v3182_v12 = vmul.f32 %v2912_v27, %v3176_v4 }
 0x13e   : > { %793 = vst [vmem:[#allocation2 + $0x99] sm:$0xff] %v760_v17  ;;  %v661_v14 = vmul.f32 %v2853_v47, %v585_v25  ;;  %v1768_v30 = vmax.f32 %v1736_v21, 0.0  ;;  %v1440_v60 = vmul.f32 %v2930_v48, %v1407_v31  ;;  %v1150_v19 = vmul.f32 %v1407_v31, %v2912_v27 }
 0x13f   : > { %v1701_v38 = vmul.f32 %v2972_v26, %v1665_v22  ;;  %v707_v36 = vadd.f32 %v2860_v49, %v671_v41  ;;  %v861_v55 = vmul.f32 %v1407_v31, %v2888_v6  ;;  %v1538_v35 = vmul.f32 %v2947_v63, %v760_v17 }
 0x140   : > { %v697_v43 = vadd.f32 %v2860_v49, %v661_v14  ;;  %v1800_v46 = vmin.f32 %v1768_v30, 6.0  ;;  %v1472_v61 = vadd.f32 %v1440_v60, %v1374_v24  ;;  %v1182_v59 = vadd.f32 %v1150_v19, %v1085_v32  ;;  %v618_v32 = vpop.f32.mrf.mxu2 }
 0x141   : > { %v1737_v51 = vadd.f32 %v2981_v34, %v1701_v38  ;;  %v1086_v53 = vadd.f32 %v1054_v50, %v989_v8  ;;  %v739_v0 = vmax.f32 %v707_v36, 0.0  ;;  %v1248_v1 = vmul.f32 %v2922_v39, %v760_v17 }
 0x142   : > { %v729_v58 = vmax.f32 %v697_v43, 0.0  ;;  %1876 = vmatmul.f32.gmra.mxu1 %v1800_v46  ;;  %v1569_v52 = vadd.f32 %v1537_v15, %v1472_v61  ;;  %v959_v2 = vmul.f32 %v2895_v10, %v760_v17  ;;  %v1279_v7 = vadd.f32 %v1247_v54, %v1182_v59 }
 0x143   : > { %v1769_v44 = vmax.f32 %v1737_v51, 0.0  ;;  %v990_v33 = vadd.f32 %v958_v57, %v861_v55  ;;  %v3184_v21 = vmin.f32 %v739_v0, 6.0  ;;  %v3188_v17 = vmul.f32 %v2922_v39, %v3023_v37 }
 0x144   : > { %v3178_v5 = vmin.f32 %v729_v58, 6.0  ;;  %v3192_v22 = vmul.f32 %v2925_v40, %v3172_v62  ;;  %v3200_v54 = vmul.f32 %v2947_v63, %v3023_v37  ;;  %v672_v30 = vmul.f32 %v2853_v47, %v618_v32 }
 0x145   : > { %v588_v13 = vpop.f32.mrf.mxu0  ;;  %v1801_v3 = vmin.f32 %v1769_v44, 6.0  ;;  %v1601_v29 = vld [vmem:[#allocation2 + $0x92] sm:$0xff]  ;;  %v1602_v15 = vld [vmem:[#allocation2 + $0x9a] sm:$0xff]  ;;  %3936 = vst [vmem:[#allocation23_spill] sm:$0xff] %v3184_v21 }
 0x146   : > { %v1408_v45 = vld [vmem:[#allocation2 + $0x98] sm:$0xff]  ;;  %794 = vst [vmem:[#allocation2 + $0xa9] sm:$0xff] %v3178_v5  ;;  %v662_v24 = vmul.f32 %v2853_v47, %v588_v13  ;;  %v1634_v25 = vmul.f32 %v2951_v9, %v1601_v29  ;;  %v1635_v8 = vmul.f32 %v2951_v9, %v1602_v15  ;;  %v1344_v14 = vmul.f32 %v1601_v29, %v2925_v40 }
 0x147   : > { %v1441_v31 = vmul.f32 %v2930_v48, %v1408_v45  ;;  %804 = vst [vmem:[#allocation2 + $0x121] sm:$0xff] %v3184_v21  ;;  %v1151_v38 = vmul.f32 %v1408_v45, %v2912_v27  ;;  %v1539_v19 = vmul.f32 %v2947_v63, %v3178_v5  ;;  %v708_v37 = vadd.f32 %v2860_v49, %v672_v30 }
 0x148   : > { %v698_v60 = vadd.f32 %v2860_v49, %v662_v24  ;;  %v1666_v18 = vadd.f32 %v1634_v25, %v1569_v52  ;;  %v1345_v43 = vmul.f32 %v1602_v15, %v2925_v40  ;;  %v1055_v46 = vmul.f32 %v1601_v29, %v2903_v16  ;;  %v621_v32 = vpop.f32.mrf.mxu2 }
 0x149   : > { %v1473_v41 = vadd.f32 %v1441_v31, %v1375_v20  ;;  %v1183_v50 = vadd.f32 %v1151_v38, %v1086_v53  ;;  %v1376_v59 = vadd.f32 %v1344_v14, %v1279_v7  ;;  %v740_v55 = vmax.f32 %v708_v37, 0.0 }
 0x14a   : > { %v730_v51 = vmax.f32 %v698_v60, 0.0  ;;  %1879 = vmatmul.f32.gmra.mxu1 %v1801_v3  ;;  %v1702_v61 = vmul.f32 %v2972_v26, %v1666_v18  ;;  %v1249_v20 = vmul.f32 %v2922_v39, %v3178_v5  ;;  %v862_v58 = vmul.f32 %v1408_v45, %v2888_v6 }
 0x14b   : > { %v1570_v36 = vadd.f32 %v1538_v35, %v1473_v41  ;;  %v1280_v57 = vadd.f32 %v1248_v1, %v1183_v50  ;;  %v1087_v0 = vadd.f32 %v1055_v46, %v990_v33  ;;  %v3220_v3 = vmin.f32 %v740_v55, 6.0 }
 0x14c   : > { %v3217_v44 = vmin.f32 %v730_v51, 6.0  ;;  %v1738_v53 = vadd.f32 %v2981_v34, %v1702_v61  ;;  %v991_v35 = vadd.f32 %v959_v2, %v862_v58  ;;  %v1056_v7 = vmul.f32 %v1602_v15, %v2903_v16 }
 0x14d   : > { %v1667_v52 = vadd.f32 %v1635_v8, %v1570_v36  ;;  %v591_v13 = vpop.f32.mrf.mxu0  ;;  %v1409_v29 = vld [vmem:[#allocation2 + $0xa8] sm:$0xff]  ;;  %3937 = vst [vmem:[#allocation24_spill] sm:$0xff] %v3220_v3  ;;  %v1377_v24 = vadd.f32 %v1345_v43, %v1280_v57  ;;  %v673_v8 = vmul.f32 %v2853_v47, %v621_v32  ;;  %v3234_v15 = vmul.f32 %v2947_v63, %v3085_v11  ;;  %v3247_v36 = vld [vmem:[#allocation2 + $0xf2] sm:$0xff] }
 0x14e   : > { %795 = vst [vmem:[#allocation2 + $0xb1] sm:$0xff] %v3217_v44  ;;  %v663_v1 = vmul.f32 %v2853_v47, %v591_v13  ;;  %v1770_v25 = vmax.f32 %v1738_v53, 0.0  ;;  %v1442_v31 = vmul.f32 %v2930_v48, %v1409_v29  ;;  %v1540_v33 = vmul.f32 %v2947_v63, %v3217_v44  ;;  %v3241_v47 = vld [vmem:[#allocation2 + $0xf0] sm:$0xff] }
 0x14f   : > { %v1703_v45 = vmul.f32 %v2972_v26, %v1667_v52  ;;  %805 = vst [vmem:[#allocation2 + $0x129] sm:$0xff] %v3220_v3  ;;  %v1152_v2 = vmul.f32 %v1409_v29, %v2912_v27  ;;  %v709_v18 = vadd.f32 %v2860_v49, %v673_v8  ;;  %v1088_v37 = vadd.f32 %v1056_v7, %v991_v35 }
 0x150   : > { %v699_v14 = vadd.f32 %v2860_v49, %v663_v1  ;;  %v1802_v30 = vmin.f32 %v1770_v25, 6.0  ;;  %v1474_v60 = vadd.f32 %v1442_v31, %v1376_v59  ;;  %v1250_v50 = vmul.f32 %v2922_v39, %v3217_v44  ;;  %3938 = vst [vmem:[#allocation25_spill] sm:$0xff] %v3247_v36  ;;  %v3249_v59 = vld [vmem:[#allocation2 + $0xe0] sm:$0xff] }
 0x151   : > { %v1739_v38 = vadd.f32 %v2981_v34, %v1703_v45  ;;  %v1184_v41 = vadd.f32 %v1152_v2, %v1087_v0  ;;  %v3245_v61 = vmul.f32 %v2930_v48, %v3241_v47  ;;  %3939 = vst [vmem:[#allocation26_spill] sm:$0xff] %v3249_v59  ;;  %v741_v49 = vmax.f32 %v709_v18, 0.0  ;;  %v624_v2 = vpop.f32.mrf.mxu2 }
 0x152   : > { %v731_v43 = vmax.f32 %v699_v14, 0.0  ;;  %1882 = vmatmul.f32.gmra.mxu1 %v1802_v30  ;;  %v1571_v51 = vadd.f32 %v1539_v19, %v1474_v60  ;;  %v3253_v55 = vmul.f32 %v2951_v9, %v3247_v36  ;;  %v863_v57 = vmul.f32 %v1409_v29, %v2888_v6 }
 0x153   : > { %v1771_v46 = vmax.f32 %v1739_v38, 0.0  ;;  %v960_v58 = vmul.f32 %v2895_v10, %v3178_v5  ;;  %v1281_v52 = vadd.f32 %v1249_v20, %v1184_v41  ;;  %v3260_v0 = vmul.f32 %v2930_v48, %v3176_v4  ;;  %v3279_v20 = vld [vmem:[%s3877_s2] ss:$0 sm:$0xff] }
 0x154   : > { %v763_v53 = vmin.f32 %v731_v43, 6.0  ;;  %v3266_v25 = vmin.f32 %v741_v49, 6.0  ;;  %v3270_v29 = vmul.f32 %v2951_v9, %v3172_v62  ;;  %v3274_v5 = vmul.f32 %v2912_v27, %v3249_v59  ;;  %v3299_v41 = vld [vmem:[%s3878_s3] ss:$0 sm:$0xff] }
 0x155   : > { %v1803_v19 = vmin.f32 %v1771_v46, 6.0  ;;  %v594_v13 = vpop.f32.mrf.mxu0  ;;  %v1603_v35 = vld [vmem:[#allocation2 + $0xaa] sm:$0xff]  ;;  %v3264_v1 = vld [vmem:[#allocation2 + $0xb2] sm:$0xff]  ;;  %v992_v45 = vadd.f32 %v960_v58, %v863_v57  ;;  %v3287_v14 = vmul.f32 %v2922_v39, %v3053_v23  ;;  %v674_v60 = vmul.f32 %v3279_v20, %v624_v2 }
 0x156   : > { %v3262_v7 = vld [vmem:[#allocation2 + $0xb0] sm:$0xff]  ;;  %3940 = vst [vmem:[#allocation27_spill] sm:$0xff] %v3266_v25  ;;  %v664_v31 = vmul.f32 %v3279_v20, %v594_v13  ;;  %v1636_v32 = vmul.f32 %v2951_v9, %v1603_v35  ;;  %v1637_v30 = vmul.f32 %v2951_v9, %v3264_v1  ;;  %v1346_v38 = vmul.f32 %v1603_v35, %v2925_v40 }
 0x157   : > { %796 = vst [vmem:[#allocation2 + $0xc1] sm:$0xff] %v763_v53  ;;  %v1443_v8 = vmul.f32 %v2930_v48, %v3262_v7  ;;  %v1153_v18 = vmul.f32 %v3262_v7, %v2912_v27  ;;  %v1541_v57 = vmul.f32 %v2947_v63, %v763_v53  ;;  %v710_v13 = vadd.f32 %v3299_v41, %v674_v60 }
 0x158   : > { %806 = vst [vmem:[#allocation2 + $0x139] sm:$0xff] %v3266_v25  ;;  %v700_v43 = vadd.f32 %v3299_v41, %v664_v31  ;;  %v1668_v46 = vadd.f32 %v1636_v32, %v1571_v51  ;;  %v1378_v58 = vadd.f32 %v1346_v38, %v1281_v52  ;;  %v1347_v2 = vmul.f32 %v3264_v1, %v2925_v40  ;;  %v3310_v52 = vld [vmem:[#allocation2 + $0xe2] sm:$0xff]  ;;  %v3317_v38 = vld [vmem:[#allocation2 + $0xf8] sm:$0xff] }
 0x159   : > { %v1475_v49 = vadd.f32 %v1443_v8, %v1377_v24  ;;  %v1185_v25 = vadd.f32 %v1153_v18, %v1088_v37  ;;  %v1057_v42 = vmul.f32 %v1603_v35, %v2903_v16  ;;  %v742_v36 = vmax.f32 %v710_v13, 0.0  ;;  %3941 = vst [vmem:[#allocation28_spill] sm:$0xff] %v3310_v52 }
 0x15a   : > { %v732_v3 = vmax.f32 %v700_v43, 0.0  ;;  %1885 = vmatmul.f32.gmra.mxu1 %v1803_v19  ;;  %v1704_v21 = vmul.f32 %v2972_v26, %v1668_v46  ;;  %v962_v24 = vmul.f32 %v2895_v10, %v763_v53  ;;  %v1251_v51 = vmul.f32 %v2922_v39, %v763_v53  ;;  %3942 = vst [vmem:[#allocation29_spill] sm:$0xff] %v3317_v38 }
 0x15b   : > { %v1572_v28 = vadd.f32 %v1540_v33, %v1475_v49  ;;  %v1282_v31 = vadd.f32 %v1250_v50, %v1185_v25  ;;  %v3315_v19 = vmul.f32 %v2925_v40, %v3310_v52  ;;  %v3319_v35 = vmin.f32 %v742_v36, 6.0 }
 0x15c   : > { %v764_v32 = vmin.f32 %v732_v3, 6.0  ;;  %v1740_v37 = vadd.f32 %v2981_v34, %v1704_v21  ;;  %v1089_v25 = vadd.f32 %v1057_v42, %v992_v45  ;;  %v3323_v53 = vmul.f32 %v2930_v48, %v3317_v38 }
 0x15d   : > { %v1669_v8 = vadd.f32 %v1637_v30, %v1572_v28  ;;  %3943 = vst [vmem:[#allocation30_spill] sm:$0xff] %v3319_v35  ;;  %v1379_v50 = vadd.f32 %v1347_v2, %v1282_v31  ;;  %v627_v30 = vpop.f32.mrf.mxu2  ;;  %v3329_v60 = vmul.f32 %v2947_v63, %v3107_v56  ;;  %v961_v56 = vmul.f32 %v2895_v10, %v3217_v44 }
 0x15e   : > { %v1411_v33 = vld [vmem:[#allocation2 + $0xc0] sm:$0xff]  ;;  %797 = vst [vmem:[#allocation2 + $0xc9] sm:$0xff] %v764_v32  ;;  %v1772_v3 = vmax.f32 %v1740_v37, 0.0  ;;  %v1542_v36 = vmul.f32 %v2947_v63, %v764_v32  ;;  %v675_v42 = vmul.f32 %v3279_v20, %v627_v30  ;;  %v963_v13 = vmul.f32 %v2895_v10, %v764_v32 }
 0x15f   : > { %v1705_v21 = vmul.f32 %v2972_v26, %v1669_v8  ;;  %v1444_v28 = vmul.f32 %v2930_v48, %v1411_v33  ;;  %807 = vst [vmem:[#allocation2 + $0x141] sm:$0xff] %v3319_v35  ;;  %v865_v45 = vmul.f32 %v1411_v33, %v2888_v6  ;;  %v1154_v18 = vmul.f32 %v1411_v33, %v2912_v27 }
 0x160   : > { %v1804_v43 = vmin.f32 %v1772_v3, 6.0  ;;  %v711_v2 = vadd.f32 %v3299_v41, %v675_v42  ;;  %v864_v8 = vmul.f32 %v3262_v7, %v2888_v6  ;;  %v1058_v33 = vmul.f32 %v3264_v1, %v2903_v16  ;;  %v931_v3 = vld [vmem:[#allocation2 + $0xd9] sm:$0xff] }
 0x161   : > { %v1741_v46 = vadd.f32 %v2981_v34, %v1705_v21  ;;  %v1476_v49 = vadd.f32 %v1444_v28, %v1378_v58  ;;  %v994_v31 = vadd.f32 %v962_v24, %v865_v45  ;;  %v1186_v37 = vadd.f32 %v1154_v18, %v1089_v25 }
 0x162   : > { %1888 = vmatmul.f32.gmra.mxu1 %v1804_v43  ;;  %v743_v58 = vmax.f32 %v711_v2, 0.0  ;;  %v1252_v28 = vmul.f32 %v2922_v39, %v764_v32  ;;  %v3348_v24 = vmul.f32 %v2930_v48, %v3249_v59  ;;  %v993_v7 = vadd.f32 %v961_v56, %v864_v8 }
 0x163   : > { %v1773_v35 = vmax.f32 %v1741_v46, 0.0  ;;  %v1573_v30 = vadd.f32 %v1541_v57, %v1476_v49  ;;  %v1283_v21 = vadd.f32 %v1251_v51, %v1186_v37  ;;  %v3352_v57 = vmul.f32 %v2947_v63, %v3053_v23 }
 0x164   : > { %v3356_v44 = vmul.f32 %v2951_v9, %v3310_v52  ;;  %v3358_v51 = vmin.f32 %v743_v58, 6.0  ;;  %v867_v32 = vmul.f32 %v3176_v4, %v2888_v6  ;;  %v964_v18 = vmul.f32 %v2895_v10, %v931_v3 }
 0x165   : > { %v1805_v25 = vmin.f32 %v1773_v35, 6.0  ;;  %v1605_v1 = vld [vmem:[#allocation2 + $0xc2] sm:$0xff]  ;;  %v1606_v45 = vld [vmem:[#allocation2 + $0xca] sm:$0xff]  ;;  %v1061_v56 = vmul.f32 %v3172_v62, %v2903_v16  ;;  %v630_v49 = vpop.f32.mrf.mxu2  ;;  %v1090_v38 = vadd.f32 %v1058_v33, %v993_v7 }
 0x166   : > { %v1412_v42 = vld [vmem:[#allocation2 + $0xc8] sm:$0xff]  ;;  %3944 = vst [vmem:[#allocation31_spill] sm:$0xff] %v3358_v51  ;;  %v1638_v23 = vmul.f32 %v2951_v9, %v1605_v1  ;;  %v1639_v43 = vmul.f32 %v2951_v9, %v1606_v45  ;;  %v1059_v46 = vmul.f32 %v1605_v1, %v2903_v16  ;;  %v1348_v2 = vmul.f32 %v1605_v1, %v2925_v40 }
 0x167   : > { %v1445_v35 = vmul.f32 %v2930_v48, %v1412_v42  ;;  %808 = vst [vmem:[#allocation2 + $0x151] sm:$0xff] %v3358_v51  ;;  %v676_v4 = vmul.f32 %v3279_v20, %v630_v49  ;;  %v866_v37 = vmul.f32 %v1412_v42, %v2888_v6  ;;  %v1060_v8 = vmul.f32 %v1606_v45, %v2903_v16 }
 0x168   : > { %v1670_v62 = vadd.f32 %v1638_v23, %v1573_v30  ;;  %v1091_v58 = vadd.f32 %v1059_v46, %v994_v31  ;;  %v1380_v52 = vadd.f32 %v1348_v2, %v1283_v21  ;;  %v1155_v59 = vmul.f32 %v1412_v42, %v2912_v27  ;;  %v3405_v46 = vld [vmem:[#allocation2 + $0xfa] sm:$0xff] }
 0x169   : > { %v1477_v3 = vadd.f32 %v1445_v35, %v1379_v50  ;;  %v712_v9 = vadd.f32 %v3299_v41, %v676_v4  ;;  %v995_v10 = vadd.f32 %v963_v13, %v866_v37  ;;  %v1349_v6 = vmul.f32 %v1606_v45, %v2925_v40  ;;  %v3411_v4 = vld [vmem:[#allocation8 + $0x8] ss:$0 sm:$0xff] }
 0x16a   : > { %1891 = vmatmul.f32.gmra.mxu1 %v1805_v25  ;;  %v1706_v51 = vmul.f32 %v2972_v26, %v1670_v62  ;;  %v1188_v49 = vadd.f32 %v3182_v12, %v1091_v58  ;;  %v1478_v16 = vadd.f32 %v3260_v0, %v1380_v52  ;;  %v1187_v31 = vadd.f32 %v1155_v59, %v1090_v38 }
 0x16b   : > { %v1574_v1 = vadd.f32 %v1542_v36, %v1477_v3  ;;  %v744_v30 = vmax.f32 %v712_v9, 0.0  ;;  %v1092_v50 = vadd.f32 %v1060_v8, %v995_v10  ;;  %v996_v7 = vadd.f32 %v964_v18, %v867_v32  ;;  %v3417_v8 = vld [vmem:[#allocation2 + $0x10a] sm:$0xff] }
 0x16c   : > { %v1742_v33 = vadd.f32 %v2981_v34, %v1706_v51  ;;  %v1285_v13 = vadd.f32 %v3188_v17, %v1188_v49  ;;  %v1575_v25 = vadd.f32 %v3200_v54, %v1478_v16  ;;  %v1284_v12 = vadd.f32 %v1252_v28, %v1187_v31  ;;  %v3946_v49 = vld [vmem:[#allocation21_spill] sm:$0xff] }
 0x16d   : > { %v1671_v21 = vadd.f32 %v1639_v43, %v1574_v1  ;;  %v3383_v42 = vmin.f32 %v744_v30, 6.0  ;;  %v1189_v36 = vadd.f32 %v3274_v5, %v1092_v50  ;;  %v633_v10 = vpop.f32.mrf.mxu2  ;;  %v1093_v59 = vadd.f32 %v1061_v56, %v996_v7 }
 0x16e   : > { %v1774_v23 = vmax.f32 %v1742_v33, 0.0  ;;  %v1382_v0 = vadd.f32 %v3192_v22, %v1285_v13  ;;  %v1672_v52 = vadd.f32 %v3270_v29, %v1575_v25  ;;  %v1381_v38 = vadd.f32 %v1349_v6, %v1284_v12  ;;  %v3440_v13 = vld [vmem:[%s3881_s6] ss:$0 sm:$0xff] }
 0x16f   : > { %v1707_v45 = vmul.f32 %v2972_v26, %v1671_v21  ;;  %809 = vst [vmem:[#allocation2 + $0x159] sm:$0xff] %v3383_v42  ;;  %v1286_v17 = vadd.f32 %v3287_v14, %v1189_v36  ;;  %v677_v16 = vmul.f32 %v3279_v20, %v633_v10  ;;  %v1158_v51 = vmul.f32 %v3241_v47, %v2912_v27  ;;  %v3947_v12 = vld [vmem:[#allocation17_spill] sm:$0xff] }
 0x170   : > { %v1806_v54 = vmin.f32 %v1774_v23, 6.0  ;;  %v1480_v28 = vadd.f32 %v3245_v61, %v1382_v0  ;;  %v1708_v22 = vmul.f32 %v2972_v26, %v1672_v52  ;;  %v1479_v29 = vadd.f32 %v3348_v24, %v1381_v38  ;;  %v3408_v24 = vld [vmem:[#allocation2 + $0x108] sm:$0xff]  ;;  %v3951_v38 = vld [vmem:[#allocation28_spill] sm:$0xff] }
 0x171   : > { %v1743_v5 = vadd.f32 %v2981_v34, %v1707_v45  ;;  %v1383_v32 = vadd.f32 %v3315_v19, %v1286_v17  ;;  %v713_v18 = vadd.f32 %v3299_v41, %v677_v16  ;;  %v1190_v56 = vadd.f32 %v1158_v51, %v1093_v59  ;;  %v3948_v23 = vld [vmem:[#allocation26_spill] sm:$0xff]  ;;  %v3950_v17 = vld [vmem:[#allocation19_spill] sm:$0xff] }
 0x172   : > { %1894 = vmatmul.f32.gmra.mxu1 %v1806_v54  ;;  %v1577_v14 = vadd.f32 %v3234_v15, %v1480_v28  ;;  %v1255_v35 = vmul.f32 %v2922_v39, %v3085_v11  ;;  %v1744_v61 = vadd.f32 %v2981_v34, %v1708_v22  ;;  %v1576_v26 = vadd.f32 %v3352_v57, %v1479_v29  ;;  %v3945_v11 = vld [vmem:[#allocation25_spill] sm:$0xff]  ;;  %v3949_v59 = vld [vmem:[#allocation18_spill] sm:$0xff] }
 0x173   : > { %v1775_v6 = vmax.f32 %v1743_v5, 0.0  ;;  %v1481_v43 = vadd.f32 %v3323_v53, %v1383_v32  ;;  %v745_v19 = vmax.f32 %v713_v18, 0.0  ;;  %v1643_v15 = vmul.f32 %v3411_v4, %v3405_v46  ;;  %v3952_v29 = vld [vmem:[#allocation29_spill] sm:$0xff] }
 0x174   : > { %v1674_v2 = vadd.f32 %v3253_v55, %v1577_v14  ;;  %v1287_v37 = vadd.f32 %v1255_v35, %v1190_v56  ;;  %v1352_v34 = vmul.f32 %v3945_v11, %v2925_v40  ;;  %v1673_v57 = vadd.f32 %v3356_v44, %v1576_v26  ;;  %v3426_v55 = vld [vmem:[%s3880_s5] ss:$0 sm:$0xff] }
 0x175   : > { %v1807_v53 = vmin.f32 %v1775_v6, 6.0  ;;  %v1578_v62 = vadd.f32 %v3329_v60, %v1481_v43  ;;  %v3421_v3 = vmin.f32 %v745_v19, 6.0  ;;  %v1450_v1 = vmul.f32 %v2930_v48, %v3408_v24  ;;  %v636_v50 = vpop.f32.mrf.mxu2  ;;  %v932_v60 = vld [vmem:[#allocation2 + $0xe1] sm:$0xff]  ;;  %v3953_v43 = vld [vmem:[#allocation20_spill] sm:$0xff]  ;;  %v3457_v19 = vld [vmem:[#allocation2 + $0x110] sm:$0xff] }
 0x176   : > { %v1710_v58 = vmul.f32 %v3426_v55, %v1674_v2  ;;  %v1384_v9 = vadd.f32 %v1352_v34, %v1287_v37  ;;  %v1547_v30 = vmul.f32 %v2947_v63, %v3946_v49  ;;  %v1776_v31 = vmax.f32 %v1744_v61, 0.0  ;;  %v933_v2 = vld [vmem:[#allocation2 + $0xf1] sm:$0xff] }
 0x177   : > { %v1675_v44 = vadd.f32 %v1643_v15, %v1578_v62  ;;  %v1709_v33 = vmul.f32 %v3426_v55, %v1673_v57  ;;  %810 = vst [vmem:[#allocation2 + $0x169] sm:$0xff] %v3421_v3  ;;  %v1644_v21 = vmul.f32 %v3411_v4, %v3417_v8  ;;  %v678_v36 = vmul.f32 %v3279_v20, %v636_v50  ;;  %v3464_v62 = vld [vmem:[#allocation2 + $0x112] sm:$0xff] }
 0x178   : > { %v1746_v7 = vadd.f32 %v3440_v13, %v1710_v58  ;;  %v1482_v25 = vadd.f32 %v1450_v1, %v1384_v9  ;;  %v868_v45 = vmul.f32 %v3948_v23, %v3947_v12  ;;  %v965_v52 = vmul.f32 %v3949_v59, %v932_v60 }
 0x179   : > { %v1711_v0 = vmul.f32 %v3426_v55, %v1675_v44  ;;  %v1745_v10 = vadd.f32 %v3440_v13, %v1709_v33  ;;  %v1062_v16 = vmul.f32 %v3951_v38, %v3950_v17  ;;  %v714_v28 = vadd.f32 %v3299_v41, %v678_v36  ;;  %v934_v36 = vld [vmem:[#allocation2 + $0xf9] sm:$0xff] }
 0x17a   : > { %1897 = vmatmul.f32.gmra.mxu1 %v1807_v53  ;;  %v1778_v54 = vmax.f32 %v1746_v7, 0.0  ;;  %v1579_v5 = vadd.f32 %v1547_v30, %v1482_v25  ;;  %v997_v32 = vadd.f32 %v965_v52, %v868_v45  ;;  %v1159_v18 = vmul.f32 %v3952_v29, %v2912_v27 }
 0x17b   : > { %v1747_v51 = vadd.f32 %v3440_v13, %v1711_v0  ;;  %v1777_v22 = vmax.f32 %v1745_v10, 0.0  ;;  %v746_v56 = vmax.f32 %v714_v28, 0.0  ;;  %v1808_v35 = vmin.f32 %v1776_v31, 6.0 }
 0x17c   : > { %v1810_v6 = vmin.f32 %v1778_v54, 6.0  ;;  %v1676_v14 = vadd.f32 %v1644_v21, %v1579_v5  ;;  %v1094_v61 = vadd.f32 %v1062_v16, %v997_v32  ;;  %v1256_v26 = vmul.f32 %v2922_v39, %v3953_v43  ;;  %v3954_v21 = vld [vmem:[#allocation22_spill] sm:$0xff] }
 0x17d   : > { %v1779_v15 = vmax.f32 %v1747_v51, 0.0  ;;  %v3460_v34 = vmin.f32 %v746_v56, 6.0  ;;  %v1353_v53 = vmul.f32 %v3405_v46, %v2925_v40  ;;  %v639_v57 = vpop.f32.mrf.mxu2  ;;  %v1809_v58 = vmin.f32 %v1777_v22, 6.0  ;;  %v3487_v54 = vld [vmem:[#allocation2 + $0x122] sm:$0xff] }
 0x17e   : > { %1906 = vmatmul.f32.vlgmr.msra.gmra.mxu3 %v1810_v6  ;;  %v1712_v37 = vmul.f32 %v3426_v55, %v1676_v14  ;;  %v1191_v9 = vadd.f32 %v1159_v18, %v1094_v61  ;;  %v679_v1 = vmul.f32 %v3279_v20, %v639_v57  ;;  %v869_v30 = vmul.f32 %v3241_v47, %v3947_v12  ;;  %v3955_v14 = vld [vmem:[#allocation23_spill] sm:$0xff] }
 0x17f   : > { %811 = vst [vmem:[#allocation2 + $0x171] sm:$0xff] %v3460_v34  ;;  %v1451_v60 = vmul.f32 %v2930_v48, %v3457_v19  ;;  %v966_v31 = vmul.f32 %v3949_v59, %v933_v2  ;;  %v1063_v44 = vmul.f32 %v3945_v11, %v3950_v17  ;;  %v1548_v7 = vmul.f32 %v2947_v63, %v3954_v21  ;;  %v3485_v11 = vld [vmem:[#allocation2 + $0x120] sm:$0xff] }
 0x180   : > { %v1748_v50 = vadd.f32 %v3440_v13, %v1712_v37  ;;  %v1288_v33 = vadd.f32 %v1256_v26, %v1191_v9  ;;  %v1645_v25 = vmul.f32 %v3411_v4, %v3464_v62  ;;  %v715_v47 = vadd.f32 %v3299_v41, %v679_v1  ;;  %v3510_v1 = vld [vmem:[#allocation2 + $0x128] sm:$0xff] }
 0x181   : > { %v1811_v23 = vmin.f32 %v1779_v15, 6.0  ;;  %v998_v45 = vadd.f32 %v966_v31, %v869_v30  ;;  %v1160_v0 = vmul.f32 %v3408_v24, %v2912_v27  ;;  %v1257_v10 = vmul.f32 %v2922_v39, %v3946_v49 }
 0x182   : > { %1900 = vmatmul.f32.gmra.mxu1 %v1808_v35  ;;  %v1780_v52 = vmax.f32 %v1748_v50, 0.0  ;;  %v1385_v38 = vadd.f32 %v1353_v53, %v1288_v33  ;;  %v747_v16 = vmax.f32 %v715_v47, 0.0  ;;  %v870_v5 = vmul.f32 %v3952_v29, %v3947_v12  ;;  %v935_v35 = vld [vmem:[#allocation2 + $0x109] sm:$0xff] }
 0x183   : > { %v1095_v28 = vadd.f32 %v1063_v44, %v998_v45  ;;  %v1354_v51 = vmul.f32 %v3417_v8, %v2925_v40  ;;  %v967_v22 = vmul.f32 %v3949_v59, %v934_v36  ;;  %v1064_v32 = vmul.f32 %v3405_v46, %v3950_v17  ;;  %v936_v45 = vld [vmem:[#allocation2 + $0x111] sm:$0xff] }
 0x184   : > { %v1483_v49 = vadd.f32 %v1451_v60, %v1385_v38  ;;  %v3496_v18 = vmin.f32 %v747_v16, 6.0  ;;  %v1452_v6 = vmul.f32 %v2930_v48, %v3485_v11  ;;  %v1549_v56 = vmul.f32 %v2947_v63, %v3955_v14  ;;  %v3536_v16 = vld [vmem:[#allocation2 + $0x138] sm:$0xff] }
 0x185   : > { %v1192_v29 = vadd.f32 %v1160_v0, %v1095_v28  ;;  %v1646_v61 = vmul.f32 %v3411_v4, %v3487_v54  ;;  %v642_v43 = vpop.f32.mrf.mxu2  ;;  %v999_v26 = vadd.f32 %v967_v22, %v870_v5  ;;  %v1161_v46 = vmul.f32 %v3457_v19, %v2912_v27 }
 0x186   : > { %1909 = vmatmul.f32.gmra.mxu3 %v1811_v23  ;;  %v1812_v2 = vmin.f32 %v1780_v52, 6.0  ;;  %v1580_v15 = vadd.f32 %v1548_v7, %v1483_v49  ;;  %812 = vst [vmem:[#allocation2 + $0x181] sm:$0xff] %v3496_v18  ;;  %v680_v37 = vmul.f32 %v3279_v20, %v642_v43  ;;  %v1258_v53 = vmul.f32 %v2922_v39, %v3954_v21 }
 0x187   : > { %v1289_v57 = vadd.f32 %v1257_v10, %v1192_v29  ;;  %v1096_v9 = vadd.f32 %v1064_v32, %v999_v26  ;;  %v871_v30 = vmul.f32 %v3408_v24, %v3947_v12  ;;  %v968_v50 = vmul.f32 %v3949_v59, %v935_v35  ;;  %v3532_v10 = vld [vmem:[#allocation2 + $0x12a] sm:$0xff]  ;;  %v3548_v32 = vld [vmem:[%s3884_s9] ss:$0 sm:$0xff] }
 0x188   : > { %v1677_v60 = vadd.f32 %v1645_v25, %v1580_v15  ;;  %v716_v31 = vadd.f32 %v3299_v41, %v680_v37  ;;  %v1355_v44 = vmul.f32 %v3464_v62, %v2925_v40  ;;  %v1065_v20 = vmul.f32 %v3417_v8, %v3950_v17  ;;  %v3956_v41 = vld [vmem:[#allocation24_spill] sm:$0xff]  ;;  %v3530_v8 = vld [vmem:[%s3883_s8] ss:$0 sm:$0xff] }
 0x189   : > { %v1386_v33 = vadd.f32 %v1354_v51, %v1289_v57  ;;  %v1193_v21 = vadd.f32 %v1161_v46, %v1096_v9  ;;  %v1000_v7 = vadd.f32 %v968_v50, %v871_v30  ;;  %v1162_v47 = vmul.f32 %v3485_v11, %v2912_v27 }
 0x18a   : > { %1903 = vmatmul.f32.gmra.mxu1 %v1809_v58  ;;  %v1713_v24 = vmul.f32 %v3426_v55, %v1677_v60  ;;  %v748_v36 = vmax.f32 %v716_v31, 0.0  ;;  %v1453_v25 = vmul.f32 %v2930_v48, %v3510_v1  ;;  %v1550_v23 = vmul.f32 %v2947_v63, %v3956_v41 }
 0x18b   : > { %v1484_v58 = vadd.f32 %v1452_v6, %v1386_v33  ;;  %v1290_v0 = vadd.f32 %v1258_v53, %v1193_v21  ;;  %v1097_v52 = vadd.f32 %v1065_v20, %v1000_v7  ;;  %v1259_v38 = vmul.f32 %v2922_v39, %v3955_v14  ;;  %v3957_v53 = vld [vmem:[#allocation27_spill] sm:$0xff] }
 0x18c   : > { %v1749_v5 = vadd.f32 %v3440_v13, %v1713_v24  ;;  %v3539_v28 = vmin.f32 %v748_v36, 6.0  ;;  %v1356_v51 = vmul.f32 %v3487_v54, %v2925_v40  ;;  %v872_v22 = vmul.f32 %v3457_v19, %v3947_v12  ;;  %v2357_v7 = vld [vmem:[%s2776_s4] sm:$0xff] }
 0x18d   : > { %v1581_v49 = vadd.f32 %v1549_v56, %v1484_v58  ;;  %v1387_v6 = vadd.f32 %v1355_v44, %v1290_v0  ;;  %v1194_v14 = vadd.f32 %v1162_v47, %v1097_v52  ;;  %v969_v35 = vmul.f32 %v3949_v59, %v936_v45  ;;  %v3571_v45 = vld [vmem:[#allocation2 + $0x140] sm:$0xff] }
 0x18e   : > { %1912 = vmatmul.f32.gmra.mxu3 %v1812_v2  ;;  %v1781_v43 = vmax.f32 %v1749_v5, 0.0  ;;  %813 = vst [vmem:[#allocation2 + $0x189] sm:$0xff] %v3539_v28  ;;  %v1647_v26 = vmul.f32 %v3411_v4, %v3532_v10  ;;  %v1454_v19 = vmul.f32 %v2930_v48, %v3536_v16  ;;  %v1066_v46 = vmul.f32 %v3464_v62, %v3950_v17  ;;  %v937_v62 = vld [vmem:[#allocation2 + $0x121] sm:$0xff] }
 0x18f   : > { %v1859_v29 = vpop.f32.mrf.mxu1  ;;  %v1678_v56 = vadd.f32 %v1646_v61, %v1581_v49  ;;  %v1485_v15 = vadd.f32 %v1453_v25, %v1387_v6  ;;  %v1291_v37 = vadd.f32 %v1259_v38, %v1194_v14  ;;  %v1551_v57 = vmul.f32 %v2947_v63, %v3957_v53 }
 0x190   : > { %v1959_v2 = vmul.f32 %v3530_v8, %v1859_v29  ;;  %v1001_v9 = vadd.f32 %v969_v35, %v872_v22  ;;  %v1163_v30 = vmul.f32 %v3510_v1, %v2912_v27  ;;  %v1813_v20 = vmin.f32 %v1781_v43, 6.0  ;;  %v938_v29 = vld [vmem:[#allocation2 + $0x129] sm:$0xff] }
 0x191   : > { %v1714_v60 = vmul.f32 %v3426_v55, %v1678_v56  ;;  %v1582_v31 = vadd.f32 %v1550_v23, %v1485_v15  ;;  %v1388_v44 = vadd.f32 %v1356_v51, %v1291_v37  ;;  %v1260_v61 = vmul.f32 %v2922_v39, %v3956_v41  ;;  %v1615_v23 = vld [vmem:[#allocation2 + $0x13a] sm:$0xff]  ;;  %v3594_v56 = vld [vmem:[#allocation2 + $0x150] sm:$0xff] }
 0x192   : > { %v1995_v50 = vadd.f32 %v3548_v32, %v1959_v2  ;;  %v1098_v33 = vadd.f32 %v1066_v46, %v1001_v9  ;;  %v873_v21 = vmul.f32 %v3485_v11, %v3947_v12  ;;  %v1357_v0 = vmul.f32 %v3532_v10, %v2925_v40 }
 0x193   : > { %v1750_v24 = vadd.f32 %v3440_v13, %v1714_v60  ;;  %v1679_v36 = vadd.f32 %v1647_v26, %v1582_v31  ;;  %v1486_v25 = vadd.f32 %v1454_v19, %v1388_v44  ;;  %v970_v52 = vmul.f32 %v3949_v59, %v937_v62  ;;  %v3958_v26 = vld [vmem:[#allocation30_spill] sm:$0xff]  ;;  %v2358_v44 = vld [vmem:[%s2776_s4 + $0x8] sm:$0xff] }
 0x194   : > { %v2027_v47 = vadd.f32 %v2357_v7, %v1995_v50  ;;  %v1195_v58 = vadd.f32 %v1163_v30, %v1098_v33  ;;  %v1067_v41 = vmul.f32 %v3487_v54, %v3950_v17  ;;  %v1455_v51 = vmul.f32 %v2930_v48, %v3571_v45  ;;  %v1616_v50 = vld [vmem:[#allocation2 + $0x142] sm:$0xff] }
 0x195   : > { %v1715_v11 = vmul.f32 %v3426_v55, %v1679_v36  ;;  %v1002_v22 = vadd.f32 %v970_v52, %v873_v21  ;;  %v1164_v49 = vmul.f32 %v3536_v16, %v2912_v27  ;;  %v1782_v54 = vmax.f32 %v1750_v24, 0.0  ;;  %v939_v24 = vld [vmem:[#allocation2 + $0x139] sm:$0xff] }
 0x196   : > { %2059 = vst [vmem:[%s3580_s28] sm:$0xff] %v2027_v47  ;;  %1915 = vmatmul.f32.gmra.mxu3 %v1813_v20  ;;  %v1292_v5 = vadd.f32 %v1260_v61, %v1195_v58  ;;  %v1583_v14 = vadd.f32 %v1551_v57, %v1486_v25  ;;  %v1648_v35 = vmul.f32 %v3411_v4, %v1615_v23  ;;  %v3959_v25 = vld [vmem:[#allocation31_spill] sm:$0xff] }
 0x197   : > { %v1862_v38 = vpop.f32.mrf.mxu1  ;;  %v1552_v19 = vmul.f32 %v2947_v63, %v3958_v26  ;;  %v1099_v46 = vadd.f32 %v1067_v41, %v1002_v22  ;;  %v1261_v2 = vmul.f32 %v2922_v39, %v3957_v53  ;;  %v1751_v37 = vadd.f32 %v3440_v13, %v1715_v11 }
 0x198   : > { %v1960_v6 = vmul.f32 %v3530_v8, %v1862_v38  ;;  %v1389_v43 = vadd.f32 %v1357_v0, %v1292_v5  ;;  %v1358_v57 = vmul.f32 %v1615_v23, %v2925_v40  ;;  %v874_v9 = vmul.f32 %v3510_v1, %v3947_v12 }
 0x199   : > { %v1196_v60 = vadd.f32 %v1164_v49, %v1099_v46  ;;  %v971_v31 = vmul.f32 %v3949_v59, %v938_v29  ;;  %v1068_v53 = vmul.f32 %v3532_v10, %v3950_v17  ;;  %v1814_v20 = vmin.f32 %v1782_v54, 6.0  ;;  %v1617_v29 = vld [vmem:[#allocation2 + $0x152] sm:$0xff] }
 0x19a   : > { %v1996_v15 = vadd.f32 %v3548_v32, %v1960_v6  ;;  %v1487_v30 = vadd.f32 %v1455_v51, %v1389_v43  ;;  %v1680_v33 = vadd.f32 %v1648_v35, %v1583_v14  ;;  %v1456_v61 = vmul.f32 %v2930_v48, %v3594_v56  ;;  %v1424_v43 = vld [vmem:[#allocation2 + $0x158] sm:$0xff] }
 0x19b   : > { %v1293_v7 = vadd.f32 %v1261_v2, %v1196_v60  ;;  %v1003_v47 = vadd.f32 %v971_v31, %v874_v9  ;;  %v1165_v1 = vmul.f32 %v3571_v45, %v2912_v27  ;;  %v1649_v36 = vmul.f32 %v3411_v4, %v1616_v50 }
 0x19c   : > { %v2028_v62 = vadd.f32 %v2358_v44, %v1996_v15  ;;  %v1584_v21 = vadd.f32 %v1552_v19, %v1487_v30  ;;  %v1553_v10 = vmul.f32 %v2947_v63, %v3959_v25  ;;  %v1783_v0 = vmax.f32 %v1751_v37, 0.0  ;;  %v940_v15 = vld [vmem:[#allocation2 + $0x141] sm:$0xff] }
 0x19d   : > { %v1390_v52 = vadd.f32 %v1358_v57, %v1293_v7  ;;  %v1100_v41 = vadd.f32 %v1068_v53, %v1003_v47  ;;  %v1262_v11 = vmul.f32 %v2922_v39, %v3958_v26  ;;  %v1716_v5 = vmul.f32 %v3426_v55, %v1680_v33  ;;  %v2359_v37 = vld [vmem:[%s2776_s4 + $0x10] sm:$0xff] }
 0x19e   : > { %2060 = vst [vmem:[%s3580_s28 + $0x8] sm:$0xff] %v2028_v62  ;;  %1918 = vmatmul.f32.gmra.mxu3 %v1814_v20  ;;  %v875_v51 = vmul.f32 %v3536_v16, %v3947_v12  ;;  %v972_v22 = vmul.f32 %v3949_v59, %v939_v24  ;;  %v1359_v54 = vmul.f32 %v1616_v50, %v2925_v40  ;;  %v1815_v46 = vmin.f32 %v1783_v0, 6.0 }
 0x19f   : > { %v1865_v58 = vpop.f32.mrf.mxu1  ;;  %v1488_v49 = vadd.f32 %v1456_v61, %v1390_v52  ;;  %v1197_v6 = vadd.f32 %v1165_v1, %v1100_v41  ;;  %v1069_v14 = vmul.f32 %v1615_v23, %v3950_v17  ;;  %v1166_v19 = vmul.f32 %v3594_v56, %v2912_v27  ;;  %v3642_v41 = vld [vmem:[#allocation2 + $0x168] sm:$0xff] }
 0x1a0   : > { %v1961_v38 = vmul.f32 %v3530_v8, %v1865_v58  ;;  %v1004_v26 = vadd.f32 %v972_v22, %v875_v51  ;;  %v1752_v9 = vadd.f32 %v3440_v13, %v1716_v5  ;;  %v1681_v30 = vadd.f32 %v1649_v36, %v1584_v21  ;;  %v2360_v5 = vld [vmem:[%s2776_s4 + $0x18] sm:$0xff] }
 0x1a1   : > { %v1585_v2 = vadd.f32 %v1553_v10, %v1488_v49  ;;  %v1294_v16 = vadd.f32 %v1262_v11, %v1197_v6  ;;  %v1650_v23 = vmul.f32 %v3411_v4, %v1617_v29  ;;  %v1457_v53 = vmul.f32 %v2930_v48, %v1424_v43 }
 0x1a2   : > { %v1997_v35 = vadd.f32 %v3548_v32, %v1961_v38  ;;  %v1101_v60 = vadd.f32 %v1069_v14, %v1004_v26  ;;  %v1263_v44 = vmul.f32 %v2922_v39, %v3959_v25  ;;  %v876_v20 = vmul.f32 %v3571_v45, %v3947_v12  ;;  %v1618_v45 = vld [vmem:[#allocation2 + $0x15a] sm:$0xff] }
 0x1a3   : > { %v1391_v31 = vadd.f32 %v1359_v54, %v1294_v16  ;;  %v973_v33 = vmul.f32 %v3949_v59, %v940_v15  ;;  %v1070_v21 = vmul.f32 %v1616_v50, %v3950_v17  ;;  %v1784_v47 = vmax.f32 %v1752_v9, 0.0  ;;  %v941_v50 = vld [vmem:[#allocation2 + $0x151] sm:$0xff] }
 0x1a4   : > { %v2029_v57 = vadd.f32 %v2359_v37, %v1997_v35  ;;  %v1198_v62 = vadd.f32 %v1166_v19, %v1101_v60  ;;  %v1717_v1 = vmul.f32 %v3426_v55, %v1681_v30  ;;  %v1682_v36 = vadd.f32 %v1650_v23, %v1585_v2 }
 0x1a5   : > { %v1005_v24 = vadd.f32 %v973_v33, %v876_v20  ;;  %v1554_v25 = vmul.f32 %v2947_v63, %v3383_v42  ;;  %v1489_v58 = vadd.f32 %v1457_v53, %v1391_v31  ;;  %v1360_v52 = vmul.f32 %v1617_v29, %v2925_v40  ;;  %v3663_v31 = vld [vmem:[#allocation2 + $0x16a] sm:$0xff] }
 0x1a6   : > { %2061 = vst [vmem:[%s3580_s28 + $0x10] sm:$0xff] %v2029_v57  ;;  %1921 = vmatmul.f32.gmra.mxu3 %v1815_v46  ;;  %v1295_v0 = vadd.f32 %v1263_v44, %v1198_v62  ;;  %v1167_v38 = vmul.f32 %v1424_v43, %v2912_v27  ;;  %v1816_v22 = vmin.f32 %v1784_v47, 6.0  ;;  %v1753_v49 = vadd.f32 %v3440_v13, %v1717_v1  ;;  %v1426_v33 = vld [vmem:[#allocation2 + $0x170] sm:$0xff] }
 0x1a7   : > { %v1868_v61 = vpop.f32.mrf.mxu1  ;;  %v1102_v11 = vadd.f32 %v1070_v21, %v1005_v24  ;;  %v877_v6 = vmul.f32 %v3594_v56, %v3947_v12  ;;  %v1718_v54 = vmul.f32 %v3426_v55, %v1682_v36  ;;  %v1651_v14 = vmul.f32 %v3411_v4, %v1618_v45  ;;  %v2361_v1 = vld [vmem:[%s2776_s4 + $0x20] sm:$0xff] }
 0x1a8   : > { %v1962_v7 = vmul.f32 %v3530_v8, %v1868_v61  ;;  %v974_v35 = vmul.f32 %v3949_v59, %v941_v50  ;;  %v1586_v26 = vadd.f32 %v1554_v25, %v1489_v58  ;;  %v1392_v19 = vadd.f32 %v1360_v52, %v1295_v0 }
 0x1a9   : > { %v1458_v46 = vmul.f32 %v2930_v48, %v3642_v41  ;;  %v1199_v16 = vadd.f32 %v1167_v38, %v1102_v11  ;;  %v1264_v15 = vmul.f32 %v2922_v39, %v3383_v42  ;;  %v1071_v56 = vmul.f32 %v1617_v29, %v3950_v17  ;;  %v1620_v11 = vld [vmem:[#allocation2 + $0x172] sm:$0xff] }
 0x1aa   : > { %v1998_v10 = vadd.f32 %v3548_v32, %v1962_v7  ;;  %v1006_v37 = vadd.f32 %v974_v35, %v877_v6  ;;  %v1785_v9 = vmax.f32 %v1753_v49, 0.0  ;;  %v878_v30 = vmul.f32 %v1424_v43, %v3947_v12 }
 0x1ab   : > { %v1754_v60 = vadd.f32 %v3440_v13, %v1718_v54  ;;  %v1555_v23 = vmul.f32 %v2947_v63, %v3421_v3  ;;  %v1361_v53 = vmul.f32 %v1618_v45, %v2925_v40  ;;  %v975_v44 = vmul.f32 %v3949_v59, %v3383_v42 }
 0x1ac   : > { %v2030_v51 = vadd.f32 %v2360_v5, %v1998_v10  ;;  %v1683_v62 = vadd.f32 %v1651_v14, %v1586_v26  ;;  %v1490_v20 = vadd.f32 %v1458_v46, %v1392_v19  ;;  %v1072_v43 = vmul.f32 %v1618_v45, %v3950_v17  ;;  %v1428_v5 = vld [vmem:[#allocation2 + $0x188] sm:$0xff] }
 0x1ad   : > { %v1296_v61 = vadd.f32 %v1264_v15, %v1199_v16  ;;  %v1103_v21 = vadd.f32 %v1071_v56, %v1006_v37  ;;  %v1168_v7 = vmul.f32 %v3642_v41, %v2912_v27  ;;  %v1007_v47 = vadd.f32 %v975_v44, %v878_v30  ;;  %v1427_v56 = vld [vmem:[#allocation2 + $0x180] sm:$0xff] }
 0x1ae   : > { %2062 = vst [vmem:[%s3580_s28 + $0x18] sm:$0xff] %v2030_v51  ;;  %1924 = vmatmul.f32.gmra.mxu3 %v1816_v22  ;;  %v1817_v36 = vmin.f32 %v1785_v9, 6.0  ;;  %v1652_v42 = vmul.f32 %v3411_v4, %v3663_v31  ;;  %v1169_v25 = vmul.f32 %v1426_v33, %v2912_v27  ;;  %v1786_v10 = vmax.f32 %v1754_v60, 0.0 }
 0x1af   : > { %v1871_v2 = vpop.f32.mrf.mxu1  ;;  %v1459_v58 = vmul.f32 %v2930_v48, %v1426_v33  ;;  %v1104_v0 = vadd.f32 %v1072_v43, %v1007_v47  ;;  %v1266_v45 = vmul.f32 %v2922_v39, %v3460_v34  ;;  %v1719_v52 = vmul.f32 %v3426_v55, %v1683_v62 }
 0x1b0   : > { %v1963_v57 = vmul.f32 %v3530_v8, %v1871_v2  ;;  %v1587_v50 = vadd.f32 %v1555_v23, %v1490_v20  ;;  %v1265_v38 = vmul.f32 %v2922_v39, %v3421_v3  ;;  %v1393_v22 = vadd.f32 %v1361_v53, %v1296_v61  ;;  %v2362_v23 = vld [vmem:[%s2776_s4 + $0x28] sm:$0xff] }
 0x1b1   : > { %v1200_v49 = vadd.f32 %v1168_v7, %v1103_v21  ;;  %v1201_v6 = vadd.f32 %v1169_v25, %v1104_v0  ;;  %v1363_v54 = vmul.f32 %v1620_v11, %v2925_v40  ;;  %v1818_v35 = vmin.f32 %v1786_v10, 6.0 }
 0x1b2   : > { %v1999_v29 = vadd.f32 %v3548_v32, %v1963_v57  ;;  %v1556_v26 = vmul.f32 %v2947_v63, %v3460_v34  ;;  %v1461_v46 = vmul.f32 %v2930_v48, %v1428_v5  ;;  %v1755_v16 = vadd.f32 %v3440_v13, %v1719_v52 }
 0x1b3   : > { %v1298_v19 = vadd.f32 %v1266_v45, %v1201_v6  ;;  %v1684_v15 = vadd.f32 %v1652_v42, %v1587_v50  ;;  %v1362_v37 = vmul.f32 %v3663_v31, %v2925_v40  ;;  %v1491_v57 = vadd.f32 %v1459_v58, %v1393_v22 }
 0x1b4   : > { %v2031_v24 = vadd.f32 %v2361_v1, %v1999_v29  ;;  %v1297_v9 = vadd.f32 %v1265_v38, %v1200_v49  ;;  %v1558_v60 = vmul.f32 %v2947_v63, %v3539_v28  ;;  %v879_v44 = vmul.f32 %v3642_v41, %v3947_v12  ;;  %v1621_v38 = vld [vmem:[#allocation2 + $0x182] sm:$0xff] }
 0x1b5   : > { %v1395_v30 = vadd.f32 %v1363_v54, %v1298_v19  ;;  %v976_v29 = vmul.f32 %v3949_v59, %v3421_v3  ;;  %v880_v62 = vmul.f32 %v1426_v33, %v3947_v12  ;;  %v1653_v20 = vmul.f32 %v3411_v4, %v1620_v11 }
 0x1b6   : > { %2063 = vst [vmem:[%s3580_s28 + $0x20] sm:$0xff] %v2031_v24  ;;  %1927 = vmatmul.f32.gmra.mxu3 %v1817_v36  ;;  %v1460_v43 = vmul.f32 %v2930_v48, %v1427_v56  ;;  %v1787_v21 = vmax.f32 %v1755_v16, 0.0  ;;  %v1720_v7 = vmul.f32 %v3426_v55, %v1684_v15  ;;  %v977_v47 = vmul.f32 %v3949_v59, %v3460_v34  ;;  %v2364_v15 = vld [vmem:[%s2776_s4 + $0x38] sm:$0xff] }
 0x1b7   : > { %v1874_v51 = vpop.f32.mrf.mxu1  ;;  %v1493_v61 = vadd.f32 %v1461_v46, %v1395_v30  ;;  %v1074_v41 = vmul.f32 %v1620_v11, %v3950_v17  ;;  %v1588_v24 = vadd.f32 %v1556_v26, %v1491_v57  ;;  %v1394_v3 = vadd.f32 %v1362_v37, %v1297_v9  ;;  %v1622_v57 = vld [vmem:[#allocation2 + $0x18a] sm:$0xff] }
 0x1b8   : > { %v1964_v14 = vmul.f32 %v3530_v8, %v1874_v51  ;;  %v1073_v33 = vmul.f32 %v3663_v31, %v3950_v17  ;;  %v1008_v42 = vadd.f32 %v976_v29, %v879_v44  ;;  %v1009_v25 = vadd.f32 %v977_v47, %v880_v62  ;;  %v2363_v31 = vld [vmem:[%s2776_s4 + $0x30] sm:$0xff]  ;;  %v2366_v47 = vld [vmem:[%s2776_s4 + $0x40] sm:$0xff] }
 0x1b9   : > { %v1590_v12 = vadd.f32 %v1558_v60, %v1493_v61  ;;  %v1171_v10 = vmul.f32 %v1428_v5, %v2912_v27  ;;  %v1819_v59 = vmin.f32 %v1787_v21, 6.0  ;;  %v1268_v0 = vmul.f32 %v2922_v39, %v3539_v28  ;;  %v2365_v29 = vld [vmem:[#allocation2] sm:$0xff] }
 0x1ba   : > { %v2000_v2 = vadd.f32 %v3548_v32, %v1964_v14  ;;  %v1106_v34 = vadd.f32 %v1074_v41, %v1009_v25  ;;  %v1756_v45 = vadd.f32 %v3440_v13, %v1720_v7  ;;  %v1685_v52 = vadd.f32 %v1653_v20, %v1588_v24  ;;  %v1526_v20 = vld [vmem:[#allocation2 + $0x199] sm:$0xff] }
 0x1bb   : > { %v1492_v50 = vadd.f32 %v1460_v43, %v1394_v3  ;;  %v1557_v17 = vmul.f32 %v2947_v63, %v3496_v18  ;;  %v1105_v51 = vadd.f32 %v1073_v33, %v1008_v42  ;;  %v1170_v5 = vmul.f32 %v1427_v56, %v2912_v27  ;;  %v1623_v33 = vld [vmem:[#allocation2 + $0x19a] sm:$0xff] }
 0x1bc   : > { %v2032_v53 = vadd.f32 %v2362_v23, %v2000_v2  ;;  %v1203_v22 = vadd.f32 %v1171_v10, %v1106_v34  ;;  %v1788_v28 = vmax.f32 %v1756_v45, 0.0  ;;  %v1654_v14 = vmul.f32 %v3411_v4, %v1621_v38  ;;  %v2367_v45 = vld [vmem:[%s2776_s4 + $0x48] sm:$0xff] }
 0x1bd   : > { %v1589_v54 = vadd.f32 %v1557_v17, %v1492_v50  ;;  %v1721_v26 = vmul.f32 %v3426_v55, %v1685_v52  ;;  %v1202_v19 = vadd.f32 %v1170_v5, %v1105_v51  ;;  %v1267_v46 = vmul.f32 %v2922_v39, %v3496_v18 }
 0x1be   : > { %2064 = vst [vmem:[%s3580_s28 + $0x28] sm:$0xff] %v2032_v53  ;;  %1930 = vmatmul.f32.gmra.mxu3 %v1818_v35  ;;  %v1300_v49 = vadd.f32 %v1268_v0, %v1203_v22  ;;  %v1820_v2 = vmin.f32 %v1788_v28, 6.0  ;;  %v1364_v30 = vmul.f32 %v1621_v38, %v2925_v40  ;;  %v1655_v39 = vmul.f32 %v3411_v4, %v1622_v57 }
 0x1bf   : > { %v1877_v1 = vpop.f32.mrf.mxu1  ;;  %v1686_v16 = vadd.f32 %v1654_v14, %v1589_v54  ;;  %v1757_v56 = vadd.f32 %v3440_v13, %v1721_v26  ;;  %v1299_v9 = vadd.f32 %v1267_v46, %v1202_v19  ;;  %v1462_v62 = vmul.f32 %v2365_v29, %v2930_v48  ;;  %v2368_v54 = vld [vmem:[%s2776_s4 + $0x50] sm:$0xff] }
 0x1c0   : > { %v1965_v36 = vmul.f32 %v3530_v8, %v1877_v1  ;;  %v1687_v21 = vadd.f32 %v1655_v39, %v1590_v12  ;;  %v1559_v7 = vmul.f32 %v2947_v63, %v1526_v20  ;;  %v1365_v3 = vmul.f32 %v1622_v57, %v2925_v40 }
 0x1c1   : > { %v1722_v23 = vmul.f32 %v3426_v55, %v1686_v16  ;;  %v1789_v53 = vmax.f32 %v1757_v56, 0.0  ;;  %v1396_v44 = vadd.f32 %v1364_v30, %v1299_v9  ;;  %v1656_v10 = vmul.f32 %v3411_v4, %v1623_v33  ;;  %v2369_v16 = vld [vmem:[%s2776_s4 + $0x58] sm:$0xff] }
 0x1c2   : > { %v2001_v58 = vadd.f32 %v3548_v32, %v1965_v36  ;;  %v1723_v42 = vmul.f32 %v3426_v55, %v1687_v21 }
 0x1c3   : > { %v1758_v61 = vadd.f32 %v3440_v13, %v1722_v23  ;;  %v1821_v1 = vmin.f32 %v1789_v53, 6.0  ;;  %v1494_v24 = vadd.f32 %v1462_v62, %v1396_v44  ;;  %v2370_v23 = vld [vmem:[%s2776_s4 + $0x60] sm:$0xff]  ;;  %v2371_v44 = vld [vmem:[%s2776_s4 + $0x68] sm:$0xff] }
 0x1c4   : > { %v2033_v11 = vadd.f32 %v2363_v31, %v2001_v58  ;;  %v1397_v58 = vadd.f32 %v1365_v3, %v1300_v49  ;;  %v1759_v40 = vadd.f32 %v3440_v13, %v1723_v42 }
 0x1c5   : > { %v1790_v48 = vmax.f32 %v1758_v61, 0.0  ;;  %v1591_v12 = vadd.f32 %v1559_v7, %v1494_v24  ;;  %v2372_v7 = vld [vmem:[%s2776_s4 + $0x70] sm:$0xff] }
 0x1c6   : > { %2065 = vst [vmem:[%s3580_s28 + $0x30] sm:$0xff] %v2033_v11  ;;  %1933 = vmatmul.f32.gmra.mxu3 %v1819_v59  ;;  %v1527_v59 = vld [vmem:[#allocation2 + $0x1a1] sm:$0xff]  ;;  %v1495_v17 = vadd.f32 %v1462_v62, %v1397_v58  ;;  %v1791_v51 = vmax.f32 %v1759_v40, 0.0  ;;  %v2375_v58 = vld [vmem:[%s2776_s4 + $0x88] sm:$0xff] }
 0x1c7   : > { %v1880_v6 = vpop.f32.mrf.mxu1  ;;  %v1822_v0 = vmin.f32 %v1790_v48, 6.0  ;;  %v1688_v50 = vadd.f32 %v1656_v10, %v1591_v12  ;;  %v1560_v31 = vmul.f32 %v2947_v63, %v1527_v59  ;;  %v1624_v11 = vld [vmem:[#allocation2 + $0x1a2] sm:$0xff] }
 0x1c8   : > { %v1966_v35 = vmul.f32 %v3530_v8, %v1880_v6  ;;  %v1657_v6 = vmul.f32 %v3411_v4, %v1624_v11  ;;  %v1823_v63 = vmin.f32 %v1791_v51, 6.0  ;;  %v2377_v11 = vld [vmem:[%s2776_s4 + $0x98] sm:$0xff] }
 0x1c9   : > { %v1724_v22 = vmul.f32 %v3426_v55, %v1688_v50  ;;  %v1592_v49 = vadd.f32 %v1560_v31, %v1495_v17 }
 0x1ca   : > { %v2002_v27 = vadd.f32 %v3548_v32, %v1966_v35 }
 0x1cb   : > { %v1760_v35 = vadd.f32 %v3440_v13, %v1724_v22  ;;  %v1689_v26 = vadd.f32 %v1657_v6, %v1592_v49  ;;  %v2378_v49 = vld [vmem:[%s2776_s4 + $0xa0] sm:$0xff] }
 0x1cc   : > { %v2034_v37 = vadd.f32 %v2364_v15, %v2002_v27 }
 0x1cd   : > { %v1792_v27 = vmax.f32 %v1760_v35, 0.0 }
 0x1ce   : > { %2066 = vst [vmem:[%s3580_s28 + $0x38] sm:$0xff] %v2034_v37  ;;  %1936 = vmatmul.f32.gmra.mxu3 %v1820_v2  ;;  %v1725_v2 = vmul.f32 %v3426_v55, %v1689_v26 }
 0x1cf   : > { %v1883_v60 = vpop.f32.mrf.mxu1  ;;  %v1824_v37 = vmin.f32 %v1792_v27, 6.0  ;;  %v2380_v27 = vld [vmem:[%s2776_s4 + $0xb0] sm:$0xff] }
 0x1d0   : > { %v1967_v18 = vmul.f32 %v3530_v8, %v1883_v60  ;;  %v1761_v56 = vadd.f32 %v3440_v13, %v1725_v2 }
 0x1d2   : > { %v2003_v43 = vadd.f32 %v3548_v32, %v1967_v18  ;;  %v1793_v30 = vmax.f32 %v1761_v56, 0.0 }
 0x1d4   : > { %v2035_v41 = vadd.f32 %v2366_v47, %v2003_v43  ;;  %v1825_v39 = vmin.f32 %v1793_v30, 6.0 }
 0x1d6   : > { %2067 = vst [vmem:[%s3580_s28 + $0x40] sm:$0xff] %v2035_v41  ;;  %1939 = vmatmul.f32.gmra.mxu3 %v1821_v1  ;;  %v2373_v1 = vld [vmem:[%s2776_s4 + $0x80] sm:$0xff] }
 0x1d7   : > { %v1886_v36 = vpop.f32.mrf.mxu1 }
 0x1d8   : > { %v1968_v25 = vmul.f32 %v3530_v8, %v1886_v36 }
 0x1da   : > { %v2004_v34 = vadd.f32 %v3548_v32, %v1968_v25  ;;  %v2374_v25 = vld [vmem:[%s2776_s4 + $0x78] sm:$0xff] }
 0x1dc   : > { %v2036_v52 = vadd.f32 %v2367_v45, %v2004_v34  ;;  %v2376_v45 = vld [vmem:[%s2776_s4 + $0x90] sm:$0xff] }
 0x1de   : > { %2068 = vst [vmem:[%s3580_s28 + $0x48] sm:$0xff] %v2036_v52  ;;  %1942 = vmatmul.f32.gmra.mxu3 %v1822_v0 }
 0x1df   : > { %v1889_v38 = vpop.f32.mrf.mxu1 }
 0x1e0   : > { %v1969_v5 = vmul.f32 %v3530_v8, %v1889_v38 }
 0x1e2   : > { %v2005_v28 = vadd.f32 %v3548_v32, %v1969_v5 }
 0x1e4   : > { %v2037_v14 = vadd.f32 %v2368_v54, %v2005_v28 }
 0x1e6   : > { %2069 = vst [vmem:[%s3580_s28 + $0x50] sm:$0xff] %v2037_v14  ;;  %1945 = vmatmul.f32.gmra.mxu3 %v1823_v63  ;;  %v2379_v63 = vld [vmem:[%s2776_s4 + $0xa8] sm:$0xff] }
 0x1e7   : > { %v1892_v19 = vpop.f32.mrf.mxu1 }
 0x1e8   : > { %v1970_v46 = vmul.f32 %v3530_v8, %v1892_v19 }
 0x1ea   : > { %v2006_v4 = vadd.f32 %v3548_v32, %v1970_v46 }
 0x1ec   : > { %v2038_v15 = vadd.f32 %v2369_v16, %v2006_v4 }
 0x1ee   : > { %2070 = vst [vmem:[%s3580_s28 + $0x58] sm:$0xff] %v2038_v15  ;;  %1948 = vmatmul.f32.gmra.mxu3 %v1824_v37  ;;  %v2381_v37 = vld [vmem:[%s2776_s4 + $0xb8] sm:$0xff] }
 0x1ef   : > { %v1895_v57 = vpop.f32.mrf.mxu1 }
 0x1f0   : > { %v1971_v9 = vmul.f32 %v3530_v8, %v1895_v57 }
 0x1f2   : > { %v2007_v60 = vadd.f32 %v3548_v32, %v1971_v9 }
 0x1f4   : > { %v2039_v55 = vadd.f32 %v2370_v23, %v2007_v60  ;;  %v2382_v60 = vld [vmem:[%s2776_s4 + $0xc0] sm:$0xff] }
 0x1f6   : > { %2071 = vst [vmem:[%s3580_s28 + $0x60] sm:$0xff] %v2039_v55  ;;  %1951 = vmatmul.f32.gmra.mxu3 %v1825_v39 }
 0x1f7   : > { %v1898_v18 = vpop.f32.mrf.mxu1 }
 0x1f8   : > { %v1972_v13 = vmul.f32 %v3530_v8, %v1898_v18 }
 0x1fa   : > { %v2008_v53 = vadd.f32 %v3548_v32, %v1972_v13  ;;  %v2383_v13 = vld [vmem:[%s2776_s4 + $0xc8] sm:$0xff] }
 0x1fc   : > { %v2040_v29 = vadd.f32 %v2371_v44, %v2008_v53 }
 0x1fe   : > { %2072 = vst [vmem:[%s3580_s28 + $0x68] sm:$0xff] %v2040_v29 }
 0x1ff   : > { %v1901_v62 = vpop.f32.mrf.mxu1 }
 0x200   : > { %v1973_v20 = vmul.f32 %v3530_v8, %v1901_v62 }
 0x201   : > { %v1907_v43 = vpop.f32.mrf.mxu3 }
 0x202   : > { %v2009_v61 = vadd.f32 %v3548_v32, %v1973_v20  ;;  %v1975_v21 = vmul.f32 %v3530_v8, %v1907_v43  ;;  %v2384_v20 = vld [vmem:[%s2776_s4 + $0xd0] sm:$0xff] }
 0x204   : > { %v2041_v47 = vadd.f32 %v2372_v7, %v2009_v61  ;;  %v2011_v41 = vadd.f32 %v3548_v32, %v1975_v21 }
 0x206   : > { %2073 = vst [vmem:[%s3580_s28 + $0x70] sm:$0xff] %v2041_v47  ;;  %v2043_v24 = vadd.f32 %v2373_v1, %v2011_v41  ;;  %v2385_v47 = vld [vmem:[%s2776_s4 + $0xd8] sm:$0xff] }
 0x207   : > { %v1904_v3 = vpop.f32.mrf.mxu1 }
 0x208   : > { %2075 = vst [vmem:[%s3580_s28 + $0x80] sm:$0xff] %v2043_v24  ;;  %v1974_v33 = vmul.f32 %v3530_v8, %v1904_v3 }
 0x209   : > { %v1910_v36 = vpop.f32.mrf.mxu3 }
 0x20a   : > { %v2010_v48 = vadd.f32 %v3548_v32, %v1974_v33  ;;  %v1976_v42 = vmul.f32 %v3530_v8, %v1910_v36  ;;  %v2386_v33 = vld [vmem:[%s2776_s4 + $0xe0] sm:$0xff] }
 0x20c   : > { %v2042_v12 = vadd.f32 %v2374_v25, %v2010_v48  ;;  %v2012_v10 = vadd.f32 %v3548_v32, %v1976_v42 }
 0x20e   : > { %2074 = vst [vmem:[%s3580_s28 + $0x78] sm:$0xff] %v2042_v12  ;;  %v2044_v59 = vadd.f32 %v2375_v58, %v2012_v10  ;;  %v2387_v12 = vld [vmem:[%s2776_s4 + $0xe8] sm:$0xff] }
 0x210   : > { %2076 = vst [vmem:[%s3580_s28 + $0x88] sm:$0xff] %v2044_v59 }
 0x211   : > { %v1913_v34 = vpop.f32.mrf.mxu3 }
 0x212   : > { %v1977_v0 = vmul.f32 %v3530_v8, %v1913_v34 }
 0x214   : > { %v2013_v40 = vadd.f32 %v3548_v32, %v1977_v0  ;;  %v2388_v0 = vld [vmem:[%s2776_s4 + $0xf0] sm:$0xff] }
 0x216   : > { %v2045_v52 = vadd.f32 %v2376_v45, %v2013_v40 }
 0x218   : > { %2077 = vst [vmem:[%s3580_s28 + $0x90] sm:$0xff] %v2045_v52 }
 0x219   : > { %v1916_v50 = vpop.f32.mrf.mxu3 }
 0x21a   : > { %v1978_v17 = vmul.f32 %v3530_v8, %v1916_v50 }
 0x21c   : > { %v2014_v31 = vadd.f32 %v3548_v32, %v1978_v17  ;;  %v2389_v17 = vld [vmem:[%s2776_s4 + $0xf8] sm:$0xff] }
 0x21e   : > { %v2046_v38 = vadd.f32 %v2377_v11, %v2014_v31 }
 0x220   : > { %2078 = vst [vmem:[%s3580_s28 + $0x98] sm:$0xff] %v2046_v38 }
 0x221   : > { %v1919_v51 = vpop.f32.mrf.mxu3 }
 0x222   : > { %v1979_v5 = vmul.f32 %v3530_v8, %v1919_v51 }
 0x224   : > { %v2015_v22 = vadd.f32 %v3548_v32, %v1979_v5 }
 0x226   : > { %v2047_v6 = vadd.f32 %v2378_v49, %v2015_v22 }
 0x228   : > { %2079 = vst [vmem:[%s3580_s28 + $0xa0] sm:$0xff] %v2047_v6 }
 0x229   : > { %v1922_v28 = vpop.f32.mrf.mxu3 }
 0x22a   : > { %v1980_v54 = vmul.f32 %v3530_v8, %v1922_v28 }
 0x22c   : > { %v2016_v14 = vadd.f32 %v3548_v32, %v1980_v54 }
 0x22e   : > { %v2048_v35 = vadd.f32 %v2379_v63, %v2016_v14 }
 0x230   : > { %2080 = vst [vmem:[%s3580_s28 + $0xa8] sm:$0xff] %v2048_v35 }
 0x231   : > { %v1925_v26 = vpop.f32.mrf.mxu3 }
 0x232   : > { %v1981_v19 = vmul.f32 %v3530_v8, %v1925_v26 }
 0x234   : > { %v2017_v46 = vadd.f32 %v3548_v32, %v1981_v19 }
 0x236   : > { %v2049_v2 = vadd.f32 %v2380_v27, %v2017_v46 }
 0x238   : > { %2081 = vst [vmem:[%s3580_s28 + $0xb0] sm:$0xff] %v2049_v2 }
 0x239   : > { %v1928_v4 = vpop.f32.mrf.mxu3 }
 0x23a   : > { %v1982_v16 = vmul.f32 %v3530_v8, %v1928_v4 }
 0x23c   : > { %v2018_v15 = vadd.f32 %v3548_v32, %v1982_v16 }
 0x23e   : > { %v2050_v56 = vadd.f32 %v2381_v37, %v2018_v15 }
 0x240   : > { %2082 = vst [vmem:[%s3580_s28 + $0xb8] sm:$0xff] %v2050_v56 }
 0x241   : > { %v1931_v57 = vpop.f32.mrf.mxu3 }
 0x242   : > { %v1983_v9 = vmul.f32 %v3530_v8, %v1931_v57 }
 0x244   : > { %v2019_v30 = vadd.f32 %v3548_v32, %v1983_v9 }
 0x246   : > { %v2051_v23 = vadd.f32 %v2382_v60, %v2019_v30 }
 0x248   : > { %2083 = vst [vmem:[%s3580_s28 + $0xc0] sm:$0xff] %v2051_v23 }
 0x249   : > { %v1934_v55 = vpop.f32.mrf.mxu3 }
 0x24a   : > { %v1984_v39 = vmul.f32 %v3530_v8, %v1934_v55 }
 0x24c   : > { %v2020_v18 = vadd.f32 %v3548_v32, %v1984_v39 }
 0x24e   : > { %v2052_v53 = vadd.f32 %v2383_v13, %v2020_v18 }
 0x250   : > { %2084 = vst [vmem:[%s3580_s28 + $0xc8] sm:$0xff] %v2052_v53 }
 0x251   : > { %v1937_v44 = vpop.f32.mrf.mxu3 }
 0x252   : > { %v1985_v29 = vmul.f32 %v3530_v8, %v1937_v44 }
 0x254   : > { %v2021_v62 = vadd.f32 %v3548_v32, %v1985_v29 }
 0x256   : > { %v2053_v43 = vadd.f32 %v2384_v20, %v2021_v62 }
 0x258   : > { %2085 = vst [vmem:[%s3580_s28 + $0xd0] sm:$0xff] %v2053_v43 }
 0x259   : > { %v1940_v61 = vpop.f32.mrf.mxu3 }
 0x25a   : > { %v1986_v21 = vmul.f32 %v3530_v8, %v1940_v61 }
 0x25c   : > { %v2022_v7 = vadd.f32 %v3548_v32, %v1986_v21 }
 0x25e   : > { %v2054_v41 = vadd.f32 %v2385_v47, %v2022_v7 }
 0x260   : > { %2086 = vst [vmem:[%s3580_s28 + $0xd8] sm:$0xff] %v2054_v41 }
 0x261   : > { %v1943_v1 = vpop.f32.mrf.mxu3 }
 0x262   : > { %v1987_v24 = vmul.f32 %v3530_v8, %v1943_v1 }
 0x264   : > { %v2023_v3 = vadd.f32 %v3548_v32, %v1987_v24 }
 0x266   : > { %v2055_v36 = vadd.f32 %v2386_v33, %v2023_v3 }
 0x268   : > { %2087 = vst [vmem:[%s3580_s28 + $0xe0] sm:$0xff] %v2055_v36 }
 0x269   : > { %v1946_v48 = vpop.f32.mrf.mxu3 }
 0x26a   : > { %v1988_v42 = vmul.f32 %v3530_v8, %v1946_v48 }
 0x26c   : > { %v2024_v25 = vadd.f32 %v3548_v32, %v1988_v42 }
 0x26e   : > { %v2056_v10 = vadd.f32 %v2387_v12, %v2024_v25 }
 0x270   : > { %2088 = vst [vmem:[%s3580_s28 + $0xe8] sm:$0xff] %v2056_v10 }
 0x271   : > { %v1949_v58 = vpop.f32.mrf.mxu3 }
 0x272   : > { %v1989_v59 = vmul.f32 %v3530_v8, %v1949_v58 }
 0x274   : > { %v2025_v34 = vadd.f32 %v3548_v32, %v1989_v59 }
 0x276   : > { %v2057_v40 = vadd.f32 %v2388_v0, %v2025_v34 }
 0x278   : > { %2089 = vst [vmem:[%s3580_s28 + $0xf0] sm:$0xff] %v2057_v40 }
 0x279   : > { %v1952_v45 = vpop.f32.mrf.mxu3 }
 0x27a   : > { %v1990_v52 = vmul.f32 %v3530_v8, %v1952_v45 }
 0x27c   : > { %v2026_v50 = vadd.f32 %v3548_v32, %v1990_v52 }
 0x27e   : > { %v2058_v31 = vadd.f32 %v2389_v17, %v2026_v50 }
 0x280   : > { %2090 = vst [vmem:[%s3580_s28 + $0xf8] sm:$0xff] %v2058_v31 }
 0x281   : > { %2537 = shalt.err (!%p2534_p10)
}
 0x282   : > { %s2592_s1 = smov 128   ;;  %s2593_s4 = smov 8  }
 0x283   : > { %2277 = dma.vmem_to_hbm [thread:$0]  (%p2740_p3), %s2105_s19, 4096, %s2107_s24, %s2092_s17, %s2592_s1, %s2592_s1, %s2593_s4  }
 0x284 PF: > { %s2121_s28 = sand.u32 1, %s2572_s13   ;;  %p3960_p12 = scmp.ge.s32.totalorder %s2584_s16, 2 }
 0x285   : > { %s2122_s21 = scalar_lea.sflag [#allocation5], %s2121_s28 }
 0x286   : > { %p2294_p13 = pnand %p3960_p12, %p2684_p6 }
 0x288   : > { %p2295_p0 = pneg %p2294_p13 }
 0x28a   : > { %2567 = dma.done.wait (%p2295_p0), %s2122_s21, 4096  }
 0x28b   : > { %2569 = vsyncadd (%p2295_p0), %s2122_s21, 4294963200  ;;  %s3961_s18 = sld [smem:[#allocation16_spill]]  ;;  %p25_p5 = scmp.ge.s32.totalorder %s2722_s29, 4  }
 0x28c   : > { %s3962_s13 = smov %s2576_s14  ;;  %s3963_s14 = smov %s2580_s15 }
 0x28d   : > { %s3965_s16 = smov %s2722_s29  ;;  %27 = sbr.rel (!%p25_p5) target bundleno = 11 (0xb), region = 119 }
 0x291   : > { %s3964_s15 = smov %s3961_s18 }
 0x292   :  { %2128 = vsyncpa [#allocation4], 1 }
 0x293   :  { %2130 = vsyncpa [#allocation4 + $0x1], 1 }
 0x294   :  { %2131 = vsyncpa [#allocation7], 1 }
 0x295   :  { %2132 = vsyncpa [#allocation10], 1 }
 0x296   :  { %2133 = vsyncpa [#allocation5], 1 }
 0x297   :  { %2135 = vsyncpa [#allocation5 + $0x1], 1 }

</bundles_post_ra>
